<compile_context>
chip_gen: v6e
topology: v6e:2x2x1
jax: 0.10.0
libtpu: 0.0.40
codegen_flags: <defaults>
</compile_context>

<pallas_src>
import functools

import numpy as np
import jax
import jax.numpy as jnp
from jax import lax
from jax.experimental import pallas as pl
from jax.experimental.pallas import tpu as pltpu

# ---- static configuration (mirrors the module's forward defaults) ----
C, H, W = 3, 16, 16          # small spatial stand-in for the 299x299 resize
D = C * H * W                # 768 = 6 * 128  (lane friendly)
HID = 128                    # hidden width of the synthetic model
NUM_CLASSES = 128            # synthetic "logits" width
LAYER_NUM = 5                # forward(..., layer_num=5)
ITERATIONS = 20              # forward(..., iterations=20)
LR = 0.01                    # forward(..., lr=0.01)

# TODO(synk): torch.hub pretrained inception_v3 and transforms.ToPILImage()/
# Resize((299,299)) have no clean Pallas equivalent at synthetic scale; the
# kernel assumes the image is already at working resolution and replaces the
# network with the deterministic MLP above, keeping only Normalize(mean, std).


def deepdream_kernel(x_ref, scale_ref, shift_ref, w1t_ref, b1_ref, lrw2c_ref,
                     gc_ref, o_ref):
    # 1) transforms.Normalize folded into one FMA: x0 = x * (1/std) + (-mean/std)
    x0 = x_ref[...] * scale_ref[...] + shift_ref[...]              # (1, D) f32

    # 2) model forward pre-activation z0 = x0 @ W1 + b1, computed against W1^T
    #    (contract the D axis) so the 768x128 weight is DMA'd to VMEM only once.
    w1t = w1t_ref[...]                                             # (HID, D) bf16
    z0 = lax.dot_general(
        x0.astype(jnp.bfloat16), w1t,
        dimension_numbers=(((1,), (1,)), ((), ())),
        preferred_element_type=jnp.float32) + b1_ref[...]          # (1, HID) f32

    gc = gc_ref[...]                           # (HID, HID) bf16 = diag(lr*w2c) @ W1^T W1

    # 3) Gradient-ascent loop, hoisted into hidden space.  Since
    #    x_{t+1} = x_t + lr * gh_t @ W1^T, the pre-activation obeys
    #    z_{t+1} = z_t + (1 - h_t^2) @ Gc; accumulate u = sum_t (1 - h_t^2).
    def body(_, carry):
        z, u = carry
        h = jnp.tanh(z)                                            # EUP
        one_m = 1.0 - h * h                                        # (1, HID) f32
        dz = jnp.dot(one_m.astype(jnp.bfloat16), gc,
                     preferred_element_type=jnp.float32)           # MXU
        return z + dz, u + one_m

    _, u = lax.fori_loop(0, ITERATIONS, body,
                         (z0, jnp.zeros_like(z0)), unroll=True)

    # 4) Apply the accumulated image-space gradient once:
    #    x = x0 + (u * lr*w2c) @ W1^T
    s = u * lrw2c_ref[...]                                         # (1, HID) f32
    xf = x0 + jnp.dot(s.astype(jnp.bfloat16), w1t,
                      preferred_element_type=jnp.float32)          # (1, D) f32

    # 5) x = (x - x.min()) / (x.max() - x.min()); x * 255  (eps-guarded, EUP recip)
    lo = jnp.min(xf, keepdims=True)                                # (1, 1)
    hi = jnp.max(xf, keepdims=True)                                # (1, 1)
    inv = pl.reciprocal(jnp.maximum(hi - lo, 1e-12), approx=True)
    o_ref[...] = (xf - lo) * (255.0 * inv)


@functools.partial(jax.jit, static_argnames=("layer_num",))
def deep_dream_effect(x_chw, w1, b1, w2, layer_num=LAYER_NUM):
    """x_chw: (C, H, W) float32 in [0,1]. Returns (H, W, C) uint8."""
    mean = jnp.array([0.485, 0.456, 0.406], jnp.float32)
    std = jnp.array([0.229, 0.224, 0.225], jnp.float32)
    scale_flat = jnp.broadcast_to((1.0 / std)[:, None, None], (C, H, W)).reshape(1, D)
    shift_flat = jnp.broadcast_to((-mean / std)[:, None, None], (C, H, W)).reshape(1, D)

    x_flat = x_chw.astype(jnp.float32).reshape(1, D)

    # Single VMEM copy of the weight matrix (as W1^T), plus the hidden-space
    # Gram matrix pre-scaled by lr*w2[:, c]; both bf16 MXU operands (f32 acc).
    w1t = w1.T.astype(jnp.float32)                                 # (HID, D)
    w1t_bf = w1t.astype(jnp.bfloat16)
    lr_w2c = (LR * w2[:, layer_num]).reshape(1, HID).astype(jnp.float32)
    gram = jnp.dot(w1t, w1, preferred_element_type=jnp.float32)    # (HID, HID)
    gc_bf = (lr_w2c.reshape(HID, 1) * gram).astype(jnp.bfloat16)
    b1r = b1.reshape(1, HID).astype(jnp.float32)

    vmem = pl.BlockSpec(memory_space=pltpu.MemorySpace.VMEM)
    out_flat = pl.pallas_call(
        deepdream_kernel,
        out_shape=jax.ShapeDtypeStruct((1, D), jnp.float32),
        in_specs=[vmem] * 7,
        out_specs=vmem,
    )(x_flat, scale_flat, shift_flat, w1t_bf, b1r, lr_w2c, gc_bf)

    # squeeze().permute(1, 2, 0) -> HWC, then uint8 truncation (matches numpy
    # astype).  Kept outside the kernel so kernel stores stay lane-dense (768
    # lanes) instead of masked last-dim-3 partial stores.
    img = out_flat.reshape(C, H, W).transpose(1, 2, 0)
    return img.astype(jnp.uint8)


def reference_numpy(x_chw, w1, b1, w2, layer_num):
    """Pure numpy (f64) reference of the same forward semantics."""
    x = np.asarray(x_chw, np.float64)
    w1 = np.asarray(w1, np.float64)
    b1 = np.asarray(b1, np.float64)
    w2 = np.asarray(w2, np.float64)
    mean = np.array([0.485, 0.456, 0.406])[:, None, None]
    std = np.array([0.229, 0.224, 0.225])[:, None, None]
    x = ((x - mean) / std).reshape(1, D)
    for _ in range(ITERATIONS):
        h = np.tanh(x @ w1 + b1)
        grad = ((1.0 - h * h) * w2[:, layer_num]) @ w1.T
        x = x + LR * grad
    img = x.reshape(C, H, W).transpose(1, 2, 0)
    img = (img - img.min()) / (img.max() - img.min())
    return (img * 255.0).astype(np.uint8)


if __name__ == "__main__":
    key = jax.random.PRNGKey(0)
    kx, k1, kb, k2 = jax.random.split(key, 4)

    # deterministic synthetic inputs / "inception" parameters
    x = jax.random.uniform(kx, (C, H, W), dtype=jnp.float32)              # [0,1]
    w1 = 0.02 * jax.random.normal(k1, (D, HID), dtype=jnp.float32)
    b1 = 0.02 * jax.random.normal(kb, (HID,), dtype=jnp.float32)
    w2 = 0.02 * jax.random.normal(k2, (HID, NUM_CLASSES), dtype=jnp.float32)

    out = deep_dream_effect(x, w1, b1, w2, layer_num=LAYER_NUM)
    out = jax.block_until_ready(out)

    assert out.shape == (H, W, C), out.shape
    assert out.dtype == jnp.uint8, out.dtype

    ref = reference_numpy(x, w1, b1, w2, LAYER_NUM)
    diff = np.abs(np.asarray(out).astype(np.int32) - ref.astype(np.int32))
    assert int(diff.max()) <= 1, f"max |kernel - reference| = {int(diff.max())}"

    print("KERNEL_OK")
</pallas_src>

<mosaic_0001>
module attributes {stable_mosaic.version = 11 : i64} {
  func.func @deepdream_kernel(%arg0: memref<1x768xf32, #tpu.memory_space<vmem>>, %arg1: memref<1x768xf32, #tpu.memory_space<vmem>>, %arg2: memref<1x768xf32, #tpu.memory_space<vmem>>, %arg3: memref<128x768xbf16, #tpu.memory_space<vmem>>, %arg4: memref<1x128xf32, #tpu.memory_space<vmem>>, %arg5: memref<1x128xf32, #tpu.memory_space<vmem>>, %arg6: memref<128x128xbf16, #tpu.memory_space<vmem>>, %arg7: memref<1x768xf32, #tpu.memory_space<vmem>>) attributes {dimension_semantics = [], scalar_prefetch = 0 : i64, scratch_operands = 0 : i64, tpu.core_type = #tpu.core_type<tc>} {
    %c0 = arith.constant 0 : index
    %c0_0 = arith.constant 0 : index
    %0 = vector.load %arg0[%c0, %c0_0] : memref<1x768xf32, #tpu.memory_space<vmem>>, vector<1x768xf32>
    %c0_1 = arith.constant 0 : index
    %c0_2 = arith.constant 0 : index
    %1 = vector.load %arg1[%c0_1, %c0_2] : memref<1x768xf32, #tpu.memory_space<vmem>>, vector<1x768xf32>
    %2 = arith.mulf %0, %1 : vector<1x768xf32>
    %c0_3 = arith.constant 0 : index
    %c0_4 = arith.constant 0 : index
    %3 = vector.load %arg2[%c0_3, %c0_4] : memref<1x768xf32, #tpu.memory_space<vmem>>, vector<1x768xf32>
    %4 = arith.addf %2, %3 : vector<1x768xf32>
    %c0_5 = arith.constant 0 : index
    %c0_6 = arith.constant 0 : index
    %5 = vector.load %arg3[%c0_5, %c0_6] : memref<128x768xbf16, #tpu.memory_space<vmem>>, vector<128x768xbf16>
    %6 = arith.truncf %4 : vector<1x768xf32> to vector<1x768xbf16>
    %cst = arith.constant dense<0.000000e+00> : vector<1x128xf32>
    %7 = tpu.matmul %6, %5, %cst {dimension_numbers = #tpu.dot_dimension_numbers<[1], [1], [0], [0], [0, 0, 1, 0], [], []>} : vector<1x768xbf16>, vector<128x768xbf16>, vector<1x128xf32> -> vector<1x128xf32>
    %c0_7 = arith.constant 0 : index
    %c0_8 = arith.constant 0 : index
    %8 = vector.load %arg4[%c0_7, %c0_8] : memref<1x128xf32, #tpu.memory_space<vmem>>, vector<1x128xf32>
    %9 = arith.addf %7, %8 : vector<1x128xf32>
    %c0_9 = arith.constant 0 : index
    %c0_10 = arith.constant 0 : index
    %10 = vector.load %arg6[%c0_9, %c0_10] : memref<128x128xbf16, #tpu.memory_space<vmem>>, vector<128x128xbf16>
    %cst_11 = arith.constant 0.000000e+00 : f32
    %11 = vector.broadcast %cst_11 : f32 to vector<1x128xf32>
    %c0_i32 = arith.constant 0 : i32
    %12 = math.tanh %9 : vector<1x128xf32>
    %13 = arith.mulf %12, %12 : vector<1x128xf32>
    %cst_12 = arith.constant 1.000000e+00 : f32
    %14 = vector.broadcast %cst_12 : f32 to vector<1x128xf32>
    %15 = arith.subf %14, %13 : vector<1x128xf32>
    %16 = arith.truncf %15 : vector<1x128xf32> to vector<1x128xbf16>
    %cst_13 = arith.constant dense<0.000000e+00> : vector<1x128xf32>
    %17 = tpu.matmul %16, %10, %cst_13 {dimension_numbers = #tpu.dot_dimension_numbers<[1], [0], [0], [1], [0, 0, 1, 1], [], []>} : vector<1x128xbf16>, vector<128x128xbf16>, vector<1x128xf32> -> vector<1x128xf32>
    %18 = arith.addf %9, %17 : vector<1x128xf32>
    %19 = arith.addf %11, %15 : vector<1x128xf32>
    %c1_i32 = arith.constant 1 : i32
    %20 = math.tanh %18 : vector<1x128xf32>
    %21 = arith.mulf %20, %20 : vector<1x128xf32>
    %cst_14 = arith.constant 1.000000e+00 : f32
    %22 = vector.broadcast %cst_14 : f32 to vector<1x128xf32>
    %23 = arith.subf %22, %21 : vector<1x128xf32>
    %24 = arith.truncf %23 : vector<1x128xf32> to vector<1x128xbf16>
    %cst_15 = arith.constant dense<0.000000e+00> : vector<1x128xf32>
    %25 = tpu.matmul %24, %10, %cst_15 {dimension_numbers = #tpu.dot_dimension_numbers<[1], [0], [0], [1], [0, 0, 1, 1], [], []>} : vector<1x128xbf16>, vector<128x128xbf16>, vector<1x128xf32> -> vector<1x128xf32>
    %26 = arith.addf %18, %25 : vector<1x128xf32>
    %27 = arith.addf %19, %23 : vector<1x128xf32>
    %c2_i32 = arith.constant 2 : i32
    %28 = math.tanh %26 : vector<1x128xf32>
    %29 = arith.mulf %28, %28 : vector<1x128xf32>
    %cst_16 = arith.constant 1.000000e+00 : f32
    %30 = vector.broadcast %cst_16 : f32 to vector<1x128xf32>
    %31 = arith.subf %30, %29 : vector<1x128xf32>
    %32 = arith.truncf %31 : vector<1x128xf32> to vector<1x128xbf16>
    %cst_17 = arith.constant dense<0.000000e+00> : vector<1x128xf32>
    %33 = tpu.matmul %32, %10, %cst_17 {dimension_numbers = #tpu.dot_dimension_numbers<[1], [0], [0], [1], [0, 0, 1, 1], [], []>} : vector<1x128xbf16>, vector<128x128xbf16>, vector<1x128xf32> -> vector<1x128xf32>
    %34 = arith.addf %26, %33 : vector<1x128xf32>
    %35 = arith.addf %27, %31 : vector<1x128xf32>
    %c3_i32 = arith.constant 3 : i32
    %36 = math.tanh %34 : vector<1x128xf32>
    %37 = arith.mulf %36, %36 : vector<1x128xf32>
    %cst_18 = arith.constant 1.000000e+00 : f32
    %38 = vector.broadcast %cst_18 : f32 to vector<1x128xf32>
    %39 = arith.subf %38, %37 : vector<1x128xf32>
    %40 = arith.truncf %39 : vector<1x128xf32> to vector<1x128xbf16>
    %cst_19 = arith.constant dense<0.000000e+00> : vector<1x128xf32>
    %41 = tpu.matmul %40, %10, %cst_19 {dimension_numbers = #tpu.dot_dimension_numbers<[1], [0], [0], [1], [0, 0, 1, 1], [], []>} : vector<1x128xbf16>, vector<128x128xbf16>, vector<1x128xf32> -> vector<1x128xf32>
    %42 = arith.addf %34, %41 : vector<1x128xf32>
    %43 = arith.addf %35, %39 : vector<1x128xf32>
    %c4_i32 = arith.constant 4 : i32
    %44 = math.tanh %42 : vector<1x128xf32>
    %45 = arith.mulf %44, %44 : vector<1x128xf32>
    %cst_20 = arith.constant 1.000000e+00 : f32
    %46 = vector.broadcast %cst_20 : f32 to vector<1x128xf32>
    %47 = arith.subf %46, %45 : vector<1x128xf32>
    %48 = arith.truncf %47 : vector<1x128xf32> to vector<1x128xbf16>
    %cst_21 = arith.constant dense<0.000000e+00> : vector<1x128xf32>
    %49 = tpu.matmul %48, %10, %cst_21 {dimension_numbers = #tpu.dot_dimension_numbers<[1], [0], [0], [1], [0, 0, 1, 1], [], []>} : vector<1x128xbf16>, vector<128x128xbf16>, vector<1x128xf32> -> vector<1x128xf32>
    %50 = arith.addf %42, %49 : vector<1x128xf32>
    %51 = arith.addf %43, %47 : vector<1x128xf32>
    %c5_i32 = arith.constant 5 : i32
    %52 = math.tanh %50 : vector<1x128xf32>
    %53 = arith.mulf %52, %52 : vector<1x128xf32>
    %cst_22 = arith.constant 1.000000e+00 : f32
    %54 = vector.broadcast %cst_22 : f32 to vector<1x128xf32>
    %55 = arith.subf %54, %53 : vector<1x128xf32>
    %56 = arith.truncf %55 : vector<1x128xf32> to vector<1x128xbf16>
    %cst_23 = arith.constant dense<0.000000e+00> : vector<1x128xf32>
    %57 = tpu.matmul %56, %10, %cst_23 {dimension_numbers = #tpu.dot_dimension_numbers<[1], [0], [0], [1], [0, 0, 1, 1], [], []>} : vector<1x128xbf16>, vector<128x128xbf16>, vector<1x128xf32> -> vector<1x128xf32>
    %58 = arith.addf %50, %57 : vector<1x128xf32>
    %59 = arith.addf %51, %55 : vector<1x128xf32>
    %c6_i32 = arith.constant 6 : i32
    %60 = math.tanh %58 : vector<1x128xf32>
    %61 = arith.mulf %60, %60 : vector<1x128xf32>
    %cst_24 = arith.constant 1.000000e+00 : f32
    %62 = vector.broadcast %cst_24 : f32 to vector<1x128xf32>
    %63 = arith.subf %62, %61 : vector<1x128xf32>
    %64 = arith.truncf %63 : vector<1x128xf32> to vector<1x128xbf16>
    %cst_25 = arith.constant dense<0.000000e+00> : vector<1x128xf32>
    %65 = tpu.matmul %64, %10, %cst_25 {dimension_numbers = #tpu.dot_dimension_numbers<[1], [0], [0], [1], [0, 0, 1, 1], [], []>} : vector<1x128xbf16>, vector<128x128xbf16>, vector<1x128xf32> -> vector<1x128xf32>
    %66 = arith.addf %58, %65 : vector<1x128xf32>
    %67 = arith.addf %59, %63 : vector<1x128xf32>
    %c7_i32 = arith.constant 7 : i32
    %68 = math.tanh %66 : vector<1x128xf32>
    %69 = arith.mulf %68, %68 : vector<1x128xf32>
    %cst_26 = arith.constant 1.000000e+00 : f32
    %70 = vector.broadcast %cst_26 : f32 to vector<1x128xf32>
    %71 = arith.subf %70, %69 : vector<1x128xf32>
    %72 = arith.truncf %71 : vector<1x128xf32> to vector<1x128xbf16>
    %cst_27 = arith.constant dense<0.000000e+00> : vector<1x128xf32>
    %73 = tpu.matmul %72, %10, %cst_27 {dimension_numbers = #tpu.dot_dimension_numbers<[1], [0], [0], [1], [0, 0, 1, 1], [], []>} : vector<1x128xbf16>, vector<128x128xbf16>, vector<1x128xf32> -> vector<1x128xf32>
    %74 = arith.addf %66, %73 : vector<1x128xf32>
    %75 = arith.addf %67, %71 : vector<1x128xf32>
    %c8_i32 = arith.constant 8 : i32
    %76 = math.tanh %74 : vector<1x128xf32>
    %77 = arith.mulf %76, %76 : vector<1x128xf32>
    %cst_28 = arith.constant 1.000000e+00 : f32
    %78 = vector.broadcast %cst_28 : f32 to vector<1x128xf32>
    %79 = arith.subf %78, %77 : vector<1x128xf32>
    %80 = arith.truncf %79 : vector<1x128xf32> to vector<1x128xbf16>
    %cst_29 = arith.constant dense<0.000000e+00> : vector<1x128xf32>
    %81 = tpu.matmul %80, %10, %cst_29 {dimension_numbers = #tpu.dot_dimension_numbers<[1], [0], [0], [1], [0, 0, 1, 1], [], []>} : vector<1x128xbf16>, vector<128x128xbf16>, vector<1x128xf32> -> vector<1x128xf32>
    %82 = arith.addf %74, %81 : vector<1x128xf32>
    %83 = arith.addf %75, %79 : vector<1x128xf32>
    %c9_i32 = arith.constant 9 : i32
    %84 = math.tanh %82 : vector<1x128xf32>
    %85 = arith.mulf %84, %84 : vector<1x128xf32>
    %cst_30 = arith.constant 1.000000e+00 : f32
    %86 = vector.broadcast %cst_30 : f32 to vector<1x128xf32>
    %87 = arith.subf %86, %85 : vector<1x128xf32>
    %88 = arith.truncf %87 : vector<1x128xf32> to vector<1x128xbf16>
    %cst_31 = arith.constant dense<0.000000e+00> : vector<1x128xf32>
    %89 = tpu.matmul %88, %10, %cst_31 {dimension_numbers = #tpu.dot_dimension_numbers<[1], [0], [0], [1], [0, 0, 1, 1], [], []>} : vector<1x128xbf16>, vector<128x128xbf16>, vector<1x128xf32> -> vector<1x128xf32>
    %90 = arith.addf %82, %89 : vector<1x128xf32>
    %91 = arith.addf %83, %87 : vector<1x128xf32>
    %c10_i32 = arith.constant 10 : i32
    %92 = math.tanh %90 : vector<1x128xf32>
    %93 = arith.mulf %92, %92 : vector<1x128xf32>
    %cst_32 = arith.constant 1.000000e+00 : f32
    %94 = vector.broadcast %cst_32 : f32 to vector<1x128xf32>
    %95 = arith.subf %94, %93 : vector<1x128xf32>
    %96 = arith.truncf %95 : vector<1x128xf32> to vector<1x128xbf16>
    %cst_33 = arith.constant dense<0.000000e+00> : vector<1x128xf32>
    %97 = tpu.matmul %96, %10, %cst_33 {dimension_numbers = #tpu.dot_dimension_numbers<[1], [0], [0], [1], [0, 0, 1, 1], [], []>} : vector<1x128xbf16>, vector<128x128xbf16>, vector<1x128xf32> -> vector<1x128xf32>
    %98 = arith.addf %90, %97 : vector<1x128xf32>
    %99 = arith.addf %91, %95 : vector<1x128xf32>
    %c11_i32 = arith.constant 11 : i32
    %100 = math.tanh %98 : vector<1x128xf32>
    %101 = arith.mulf %100, %100 : vector<1x128xf32>
    %cst_34 = arith.constant 1.000000e+00 : f32
    %102 = vector.broadcast %cst_34 : f32 to vector<1x128xf32>
    %103 = arith.subf %102, %101 : vector<1x128xf32>
    %104 = arith.truncf %103 : vector<1x128xf32> to vector<1x128xbf16>
    %cst_35 = arith.constant dense<0.000000e+00> : vector<1x128xf32>
    %105 = tpu.matmul %104, %10, %cst_35 {dimension_numbers = #tpu.dot_dimension_numbers<[1], [0], [0], [1], [0, 0, 1, 1], [], []>} : vector<1x128xbf16>, vector<128x128xbf16>, vector<1x128xf32> -> vector<1x128xf32>
    %106 = arith.addf %98, %105 : vector<1x128xf32>
    %107 = arith.addf %99, %103 : vector<1x128xf32>
    %c12_i32 = arith.constant 12 : i32
    %108 = math.tanh %106 : vector<1x128xf32>
    %109 = arith.mulf %108, %108 : vector<1x128xf32>
    %cst_36 = arith.constant 1.000000e+00 : f32
    %110 = vector.broadcast %cst_36 : f32 to vector<1x128xf32>
    %111 = arith.subf %110, %109 : vector<1x128xf32>
    %112 = arith.truncf %111 : vector<1x128xf32> to vector<1x128xbf16>
    %cst_37 = arith.constant dense<0.000000e+00> : vector<1x128xf32>
    %113 = tpu.matmul %112, %10, %cst_37 {dimension_numbers = #tpu.dot_dimension_numbers<[1], [0], [0], [1], [0, 0, 1, 1], [], []>} : vector<1x128xbf16>, vector<128x128xbf16>, vector<1x128xf32> -> vector<1x128xf32>
    %114 = arith.addf %106, %113 : vector<1x128xf32>
    %115 = arith.addf %107, %111 : vector<1x128xf32>
    %c13_i32 = arith.constant 13 : i32
    %116 = math.tanh %114 : vector<1x128xf32>
    %117 = arith.mulf %116, %116 : vector<1x128xf32>
    %cst_38 = arith.constant 1.000000e+00 : f32
    %118 = vector.broadcast %cst_38 : f32 to vector<1x128xf32>
    %119 = arith.subf %118, %117 : vector<1x128xf32>
    %120 = arith.truncf %119 : vector<1x128xf32> to vector<1x128xbf16>
    %cst_39 = arith.constant dense<0.000000e+00> : vector<1x128xf32>
    %121 = tpu.matmul %120, %10, %cst_39 {dimension_numbers = #tpu.dot_dimension_numbers<[1], [0], [0], [1], [0, 0, 1, 1], [], []>} : vector<1x128xbf16>, vector<128x128xbf16>, vector<1x128xf32> -> vector<1x128xf32>
    %122 = arith.addf %114, %121 : vector<1x128xf32>
    %123 = arith.addf %115, %119 : vector<1x128xf32>
    %c14_i32 = arith.constant 14 : i32
    %124 = math.tanh %122 : vector<1x128xf32>
    %125 = arith.mulf %124, %124 : vector<1x128xf32>
    %cst_40 = arith.constant 1.000000e+00 : f32
    %126 = vector.broadcast %cst_40 : f32 to vector<1x128xf32>
    %127 = arith.subf %126, %125 : vector<1x128xf32>
    %128 = arith.truncf %127 : vector<1x128xf32> to vector<1x128xbf16>
    %cst_41 = arith.constant dense<0.000000e+00> : vector<1x128xf32>
    %129 = tpu.matmul %128, %10, %cst_41 {dimension_numbers = #tpu.dot_dimension_numbers<[1], [0], [0], [1], [0, 0, 1, 1], [], []>} : vector<1x128xbf16>, vector<128x128xbf16>, vector<1x128xf32> -> vector<1x128xf32>
    %130 = arith.addf %122, %129 : vector<1x128xf32>
    %131 = arith.addf %123, %127 : vector<1x128xf32>
    %c15_i32 = arith.constant 15 : i32
    %132 = math.tanh %130 : vector<1x128xf32>
    %133 = arith.mulf %132, %132 : vector<1x128xf32>
    %cst_42 = arith.constant 1.000000e+00 : f32
    %134 = vector.broadcast %cst_42 : f32 to vector<1x128xf32>
    %135 = arith.subf %134, %133 : vector<1x128xf32>
    %136 = arith.truncf %135 : vector<1x128xf32> to vector<1x128xbf16>
    %cst_43 = arith.constant dense<0.000000e+00> : vector<1x128xf32>
    %137 = tpu.matmul %136, %10, %cst_43 {dimension_numbers = #tpu.dot_dimension_numbers<[1], [0], [0], [1], [0, 0, 1, 1], [], []>} : vector<1x128xbf16>, vector<128x128xbf16>, vector<1x128xf32> -> vector<1x128xf32>
    %138 = arith.addf %130, %137 : vector<1x128xf32>
    %139 = arith.addf %131, %135 : vector<1x128xf32>
    %c16_i32 = arith.constant 16 : i32
    %140 = math.tanh %138 : vector<1x128xf32>
    %141 = arith.mulf %140, %140 : vector<1x128xf32>
    %cst_44 = arith.constant 1.000000e+00 : f32
    %142 = vector.broadcast %cst_44 : f32 to vector<1x128xf32>
    %143 = arith.subf %142, %141 : vector<1x128xf32>
    %144 = arith.truncf %143 : vector<1x128xf32> to vector<1x128xbf16>
    %cst_45 = arith.constant dense<0.000000e+00> : vector<1x128xf32>
    %145 = tpu.matmul %144, %10, %cst_45 {dimension_numbers = #tpu.dot_dimension_numbers<[1], [0], [0], [1], [0, 0, 1, 1], [], []>} : vector<1x128xbf16>, vector<128x128xbf16>, vector<1x128xf32> -> vector<1x128xf32>
    %146 = arith.addf %138, %145 : vector<1x128xf32>
    %147 = arith.addf %139, %143 : vector<1x128xf32>
    %c17_i32 = arith.constant 17 : i32
    %148 = math.tanh %146 : vector<1x128xf32>
    %149 = arith.mulf %148, %148 : vector<1x128xf32>
    %cst_46 = arith.constant 1.000000e+00 : f32
    %150 = vector.broadcast %cst_46 : f32 to vector<1x128xf32>
    %151 = arith.subf %150, %149 : vector<1x128xf32>
    %152 = arith.truncf %151 : vector<1x128xf32> to vector<1x128xbf16>
    %cst_47 = arith.constant dense<0.000000e+00> : vector<1x128xf32>
    %153 = tpu.matmul %152, %10, %cst_47 {dimension_numbers = #tpu.dot_dimension_numbers<[1], [0], [0], [1], [0, 0, 1, 1], [], []>} : vector<1x128xbf16>, vector<128x128xbf16>, vector<1x128xf32> -> vector<1x128xf32>
    %154 = arith.addf %146, %153 : vector<1x128xf32>
    %155 = arith.addf %147, %151 : vector<1x128xf32>
    %c18_i32 = arith.constant 18 : i32
    %156 = math.tanh %154 : vector<1x128xf32>
    %157 = arith.mulf %156, %156 : vector<1x128xf32>
    %cst_48 = arith.constant 1.000000e+00 : f32
    %158 = vector.broadcast %cst_48 : f32 to vector<1x128xf32>
    %159 = arith.subf %158, %157 : vector<1x128xf32>
    %160 = arith.truncf %159 : vector<1x128xf32> to vector<1x128xbf16>
    %cst_49 = arith.constant dense<0.000000e+00> : vector<1x128xf32>
    %161 = tpu.matmul %160, %10, %cst_49 {dimension_numbers = #tpu.dot_dimension_numbers<[1], [0], [0], [1], [0, 0, 1, 1], [], []>} : vector<1x128xbf16>, vector<128x128xbf16>, vector<1x128xf32> -> vector<1x128xf32>
    %162 = arith.addf %154, %161 : vector<1x128xf32>
    %163 = arith.addf %155, %159 : vector<1x128xf32>
    %c19_i32 = arith.constant 19 : i32
    %164 = math.tanh %162 : vector<1x128xf32>
    %165 = arith.mulf %164, %164 : vector<1x128xf32>
    %cst_50 = arith.constant 1.000000e+00 : f32
    %166 = vector.broadcast %cst_50 : f32 to vector<1x128xf32>
    %167 = arith.subf %166, %165 : vector<1x128xf32>
    %168 = arith.truncf %167 : vector<1x128xf32> to vector<1x128xbf16>
    %cst_51 = arith.constant dense<0.000000e+00> : vector<1x128xf32>
    %169 = tpu.matmul %168, %10, %cst_51 {dimension_numbers = #tpu.dot_dimension_numbers<[1], [0], [0], [1], [0, 0, 1, 1], [], []>} : vector<1x128xbf16>, vector<128x128xbf16>, vector<1x128xf32> -> vector<1x128xf32>
    %170 = arith.addf %162, %169 : vector<1x128xf32>
    %171 = arith.addf %163, %167 : vector<1x128xf32>
    %c0_52 = arith.constant 0 : index
    %c0_53 = arith.constant 0 : index
    %172 = vector.load %arg5[%c0_52, %c0_53] : memref<1x128xf32, #tpu.memory_space<vmem>>, vector<1x128xf32>
    %173 = arith.mulf %171, %172 : vector<1x128xf32>
    %174 = arith.truncf %173 : vector<1x128xf32> to vector<1x128xbf16>
    %cst_54 = arith.constant dense<0.000000e+00> : vector<1x768xf32>
    %175 = tpu.matmul %174, %5, %cst_54 {dimension_numbers = #tpu.dot_dimension_numbers<[1], [0], [0], [1], [0, 0, 1, 1], [], []>} : vector<1x128xbf16>, vector<128x768xbf16>, vector<1x768xf32> -> vector<1x768xf32>
    %176 = arith.addf %4, %175 : vector<1x768xf32>
    %177 = vector.shape_cast %176 : vector<1x768xf32> to vector<1x1x768xf32>
    %cst_55 = arith.constant dense<0x7F800000> : vector<1xf32>
    %178 = vector.multi_reduction <minimumf>, %177, %cst_55 [1, 2] : vector<1x1x768xf32> to vector<1xf32>
    %179 = vector.shape_cast %178 : vector<1xf32> to vector<1x1x1xf32>
    %180 = vector.extract %179[0, 0, 0] : f32 from vector<1x1x1xf32>
    %181 = vector.broadcast %180 : f32 to vector<1x1xf32>
    %182 = vector.shape_cast %176 : vector<1x768xf32> to vector<1x1x768xf32>
    %cst_56 = arith.constant dense<0xFF800000> : vector<1xf32>
    %183 = vector.multi_reduction <maximumf>, %182, %cst_56 [1, 2] : vector<1x1x768xf32> to vector<1xf32>
    %184 = vector.shape_cast %183 : vector<1xf32> to vector<1x1x1xf32>
    %185 = vector.extract %184[0, 0, 0] : f32 from vector<1x1x1xf32>
    %186 = vector.broadcast %185 : f32 to vector<1x1xf32>
    %187 = arith.subf %186, %181 : vector<1x1xf32>
    %cst_57 = arith.constant 9.99999996E-13 : f32
    %188 = vector.broadcast %cst_57 : f32 to vector<1x1xf32>
    %189 = arith.maximumf %187, %188 : vector<1x1xf32>
    %190 = tpu.reciprocal %189 {approx = true} : vector<1x1xf32> -> vector<1x1xf32>
    %191 = vector.broadcast %181 : vector<1x1xf32> to vector<1x768xf32>
    %192 = arith.subf %176, %191 : vector<1x768xf32>
    %cst_58 = arith.constant 2.550000e+02 : f32
    %193 = vector.broadcast %cst_58 : f32 to vector<1x1xf32>
    %194 = arith.mulf %193, %190 : vector<1x1xf32>
    %195 = vector.broadcast %194 : vector<1x1xf32> to vector<1x768xf32>
    %196 = arith.mulf %192, %195 : vector<1x768xf32>
    %c0_59 = arith.constant 0 : index
    %c0_60 = arith.constant 0 : index
    %197 = vector.load %arg7[%c0_59, %c0_60] : memref<1x768xf32, #tpu.memory_space<vmem>>, vector<1x768xf32>
    tpu.vector_store %arg7[%c0_59, %c0_60], %196 {strides = array<i32>} : memref<1x768xf32, #tpu.memory_space<vmem>>, vector<1x768xf32>,
    return
  }
}

</mosaic_0001>

<bundles_post_ra>
// kernel: deep_dream_effect.1
= control target key start
LH: loop header
LB: loop body
LE: loop exit
PB: predicated region body
PF: predicated region fallthrough
CT: control target
= control target key end

     0   :  { %v81_v10 = vlaneseq  ;;  %vm2476_vm0 = vmmov 0   ;;  %vm1625_vm1 = vcmask 1040384   ;;  %s3275_s3 = inlined_call_operand.vmem [shape: bf16[128,768], index: 3, kind: input, shape index: {}]   ;;  %s3276_s0 = inlined_call_operand.vmem [shape: f32[1,768], index: 0, kind: input, shape index: {}]   ;;  %s3277_s1 = inlined_call_operand.vmem [shape: f32[1,768], index: 1, kind: input, shape index: {}]   ;;  %s3278_s2 = inlined_call_operand.vmem [shape: f32[1,768], index: 2, kind: input, shape index: {}]   ;;  %s3279_s6 = inlined_call_operand.vmem [shape: bf16[128,128], index: 6, kind: input, shape index: {}]   ;;  %s3280_s4 = inlined_call_operand.vmem [shape: f32[1,128], index: 4, kind: input, shape index: {}]   ;;  %s3281_s5 = inlined_call_operand.vmem [shape: f32[1,128], index: 5, kind: input, shape index: {}]   ;;  %s3282_s7 = inlined_call_operand.vmem [shape: f32[1,768], index: 7, kind: output, shape index: {}]  }
   0x1   :  { %v2298_v0 = vld [vmem:[%s3275_s3 + $0x154] ss:$24 sps:$4 sm:$0xff]   ;;  %v2300_v1 = vld [vmem:[%s3275_s3 + $0x150] ss:$24 sps:$4 sm:$0xff]   ;;  %v2304_v4 = vld [vmem:[%s3275_s3 + $0x124] ss:$24 sps:$4 sm:$0xff]  }
   0x2   :  { %358 = vmatprep.subr.bf16.mxu0 %v2298_v0  ;;  %v2301_v2 = vld [vmem:[%s3275_s3 + $0x15c] ss:$24 sps:$4 sm:$0xff]   ;;  %v2303_v3 = vld [vmem:[%s3275_s3 + $0x158] ss:$24 sps:$4 sm:$0xff]   ;;  %v2307_v5 = vld [vmem:[%s3275_s3 + $0x12c] ss:$24 sps:$4 sm:$0xff]  }
   0x3   :  { %359 = vmatpush1.bf16.xpose.msra.mxu0 %v2300_v1  ;;  %398 = vmatprep.subr.bf16.mxu1 %v2301_v2  ;;  %v2306_v6 = vld [vmem:[%s3275_s3 + $0x120] ss:$24 sps:$4 sm:$0xff]   ;;  %v2310_v7 = vld [vmem:[%s3275_s3 + $0xf4] ss:$24 sps:$4 sm:$0xff]   ;;  %v2312_v11 = vld [vmem:[%s3275_s3 + $0xf0] ss:$24 sps:$4 sm:$0xff]  }
   0x4   :  { %399 = vmatpush1.bf16.xpose.msra.mxu1 %v2303_v3  ;;  %360 = vmatprep.subr.bf16.mxu0 %v2304_v4  ;;  %v2309_v8 = vld [vmem:[%s3275_s3 + $0x128] ss:$24 sps:$4 sm:$0xff]   ;;  %v2313_v9 = vld [vmem:[%s3275_s3 + $0xfc] ss:$24 sps:$4 sm:$0xff]   ;;  %v2315_v13 = vld [vmem:[%s3275_s3 + $0xf8] ss:$24 sps:$4 sm:$0xff]  }
   0x5   :  { %400 = vmatprep.subr.bf16.mxu1 %v2307_v5  ;;  %v2316_v12 = vld [vmem:[%s3275_s3 + $0xc4] ss:$24 sps:$4 sm:$0xff]   ;;  %v2562_v15 = vshrl.u32 %v81_v10, 7  ;;  %v2318_v22 = vld [vmem:[%s3275_s3 + $0xc0] ss:$24 sps:$4 sm:$0xff]   ;;  %vm1676_vm2 = vcmp.lt.s32.totalorder %v81_v10, 768 }
   0x6   :  { %v2319_v14 = vld [vmem:[%s3275_s3 + $0xcc] ss:$24 sps:$4 sm:$0xff]   ;;  %v2321_v25 = vld [vmem:[%s3275_s3 + $0xc8] ss:$24 sps:$4 sm:$0xff]   ;;  %v2325_v26 = vld [vmem:[%s3275_s3 + $0x9c] ss:$24 sps:$4 sm:$0xff]  }
   0x7   :  { %v27_v16 = vld [vmem:[%s3276_s0] sm:$0x3f]  ;;  %v87_v20 = vsub.s32 1, %v2562_v15  ;;  %v95_v21 = vsub.s32 3, %v2562_v15  ;;  %v2322_v23 = vld [vmem:[%s3275_s3 + $0x94] ss:$24 sps:$4 sm:$0xff]  }
   0x8   :  { %v28_v17 = vld [vmem:[%s3277_s1] sm:$0x3f]  ;;  %v2324_v31 = vld [vmem:[%s3275_s3 + $0x90] ss:$24 sps:$4 sm:$0xff]   ;;  %v2334_v36 = vld [vmem:[%s3275_s3 + $0x34] ss:$24 sps:$4 sm:$0xff]  }
   0x9   :  { %v29_v18 = vmul.f32 %v28_v17, %v27_v16  ;;  %v30_v19 = vld [vmem:[%s3278_s2] sm:$0x3f]  ;;  %v2327_v33 = vld [vmem:[%s3275_s3 + $0x98] ss:$24 sps:$4 sm:$0xff]   ;;  %v2337_v38 = vld [vmem:[%s3275_s3 + $0x3c] ss:$24 sps:$4 sm:$0xff]  }
   0xa   :  { %v2328_v32 = vld [vmem:[%s3275_s3 + $0x64] ss:$24 sps:$4 sm:$0xff]   ;;  %v2330_v35 = vld [vmem:[%s3275_s3 + $0x60] ss:$24 sps:$4 sm:$0xff]   ;;  %v2336_v39 = vld [vmem:[%s3275_s3 + $0x30] ss:$24 sps:$4 sm:$0xff]  }
   0xb   :  { %361 = vmatpush1.bf16.xpose.msra.mxu0 %v2306_v6  ;;  %v2581_v24 = vadd.f32 %v30_v19, %v29_v18  ;;  %v2331_v34 = vld [vmem:[%s3275_s3 + $0x6c] ss:$24 sps:$4 sm:$0xff]   ;;  %v2333_v37 = vld [vmem:[%s3275_s3 + $0x68] ss:$24 sps:$4 sm:$0xff]   ;;  %v2339_v41 = vld [vmem:[%s3275_s3 + $0x38] ss:$24 sps:$4 sm:$0xff]  }
   0xc   :  { %362 = vmatprep.subr.bf16.mxu0 %v2310_v7  ;;  %401 = vmatpush1.bf16.xpose.msra.mxu1 %v2309_v8  ;;  %v2340_v40 = vld [vmem:[%s3275_s3 + $0x4] ss:$24 sps:$4 sm:$0xff]   ;;  %v83_v43 = vsub.s32 0, %v2562_v15  ;;  %v2342_v44 = vld [vmem:[%s3275_s3] ss:$24 sps:$4 sm:$0xff]   ;;  %v103_v45 = vsub.s32 5, %v2562_v15 }
   0xd   :  { %402 = vmatprep.subr.bf16.mxu1 %v2313_v9  ;;  %v88_v27 = vrot.slane %v2581_v24, %v87_v20  ;;  %v96_v28 = vrot.slane %v2581_v24, %v95_v21  ;;  %v2343_v42 = vld [vmem:[%s3275_s3 + $0xc] ss:$24 sps:$4 sm:$0xff]   ;;  %v91_v47 = vsub.s32 2, %v2562_v15  ;;  %v2345_v48 = vld [vmem:[%s3275_s3 + $0x8] ss:$24 sps:$4 sm:$0xff]   ;;  %v99_v5 = vsub.s32 4, %v2562_v15 }
   0xe   :  { %v2348_v46 = vld [vmem:[%s3275_s3 + $0x164] ss:$24 sps:$4 sm:$0xff]   ;;  %v84_v49 = vrot.slane %v2581_v24, %v83_v43  ;;  %v104_v50 = vrot.slane %v2581_v24, %v103_v45  ;;  %v2346_v53 = vld [vmem:[%s3275_s3 + $0x160] ss:$24 sps:$4 sm:$0xff]   ;;  %v2351_v56 = vld [vmem:[%s3275_s3 + $0x134] ss:$24 sps:$4 sm:$0xff]  }
   0xf   :  { %v112_v29 = vpack.c.bf16 %v88_v27, %v88_v27  ;;  %v114_v30 = vpack.c.bf16 %v96_v28, %v96_v28  ;;  %v92_v51 = vrot.slane %v2581_v24, %v91_v47  ;;  %v2349_v57 = vld [vmem:[%s3275_s3 + $0x130] ss:$24 sps:$4 sm:$0xff]   ;;  %v2354_v58 = vld [vmem:[%s3275_s3 + $0x104] ss:$24 sps:$4 sm:$0xff]   ;;  %v2352_v59 = vld [vmem:[%s3275_s3 + $0x100] ss:$24 sps:$4 sm:$0xff]   ;;  %v100_v7 = vrot.slane %v2581_v24, %v99_v5 }
  0x10   :  { %v111_v52 = vpack.c.bf16 %v84_v49, %v84_v49  ;;  %v116_v54 = vpack.c.bf16 %v104_v50, %v104_v50  ;;  %v2357_v60 = vld [vmem:[%s3275_s3 + $0xd4] ss:$24 sps:$4 sm:$0xff]   ;;  %v2355_v61 = vld [vmem:[%s3275_s3 + $0xd0] ss:$24 sps:$4 sm:$0xff]   ;;  %v2360_v62 = vld [vmem:[%s3275_s3 + $0xa4] ss:$24 sps:$4 sm:$0xff]  }
  0x11   :  { %390 = vmatprep.mubr.bf16.mxu0 %v112_v29  ;;  %430 = vmatprep.mubr.bf16.mxu1 %v114_v30  ;;  %v113_v55 = vpack.c.bf16 %v92_v51, %v92_v51  ;;  %v2358_v63 = vld [vmem:[%s3275_s3 + $0xa0] ss:$24 sps:$4 sm:$0xff]   ;;  %v2363_v0 = vld [vmem:[%s3275_s3 + $0x74] ss:$24 sps:$4 sm:$0xff]   ;;  %v2361_v1 = vld [vmem:[%s3275_s3 + $0x70] ss:$24 sps:$4 sm:$0xff]   ;;  %v115_v8 = vpack.c.bf16 %v100_v7, %v100_v7 }
  0x12   :  { %v2366_v2 = vld [vmem:[%s3275_s3 + $0x44] ss:$24 sps:$4 sm:$0xff]   ;;  %v2364_v3 = vld [vmem:[%s3275_s3 + $0x40] ss:$24 sps:$4 sm:$0xff]   ;;  %v2369_v4 = vld [vmem:[%s3275_s3 + $0x14] ss:$24 sps:$4 sm:$0xff]  }
  0x13   :  { %363 = vmatpush1.bf16.xpose.msra.mxu0 %v2312_v11  ;;  %v2367_v6 = vld [vmem:[%s3275_s3 + $0x10] ss:$24 sps:$4 sm:$0xff]   ;;  %v2475_v9 = vmov 0.0   ;;  %v2705_v11 = vld [vmem:[%s3279_s6 + $0x38] sm:$0xff]   ;;  %v2769_v19 = vld [vmem:[%s3279_s6] sm:$0xff]  }
  0x14   :  { %364 = vmatprep.subr.bf16.mxu0 %v2316_v12  ;;  %403 = vmatpush1.bf16.xpose.msra.mxu1 %v2315_v13  ;;  %v2711_v12 = vld [vmem:[%s3279_s6 + $0x30] sm:$0xff]   ;;  %v2724_v13 = vld [vmem:[%s3279_s6 + $0x28] sm:$0xff]   ;;  %v2742_v16 = vld [vmem:[%s3279_s6 + $0x18] sm:$0xff]  }
  0x15   :  { %404 = vmatprep.subr.bf16.mxu1 %v2319_v14  ;;  %v2733_v14 = vld [vmem:[%s3279_s6 + $0x20] sm:$0xff]   ;;  %v2751_v17 = vld [vmem:[%s3279_s6 + $0x10] sm:$0xff]   ;;  %v2760_v18 = vld [vmem:[%s3279_s6 + $0x8] sm:$0xff]  }
  0x1b   :  { %365 = vmatpush1.bf16.xpose.msra.mxu0 %v2318_v22 }
  0x1c   :  { %366 = vmatprep.subr.bf16.mxu0 %v2322_v23  ;;  %405 = vmatpush1.bf16.xpose.msra.mxu1 %v2321_v25 }
  0x1d   :  { %406 = vmatprep.subr.bf16.mxu1 %v2325_v26 }
  0x23   :  { %367 = vmatpush1.bf16.xpose.msra.mxu0 %v2324_v31  ;;  %v117_v31 = vld [vmem:[%s3280_s4] sm:$0x1] }
  0x24   :  { %368 = vmatprep.subr.bf16.mxu0 %v2328_v32  ;;  %407 = vmatpush1.bf16.xpose.msra.mxu1 %v2327_v33 }
  0x25   :  { %408 = vmatprep.subr.bf16.mxu1 %v2331_v34 }
  0x2b   :  { %369 = vmatpush1.bf16.xpose.msra.mxu0 %v2330_v35 }
  0x2c   :  { %370 = vmatprep.subr.bf16.mxu0 %v2334_v36  ;;  %409 = vmatpush1.bf16.xpose.msra.mxu1 %v2333_v37 }
  0x2d   :  { %410 = vmatprep.subr.bf16.mxu1 %v2337_v38 }
  0x33   :  { %371 = vmatpush1.bf16.xpose.msra.mxu0 %v2336_v39 }
  0x34   :  { %372 = vmatprep.subr.bf16.mxu0 %v2340_v40  ;;  %411 = vmatpush1.bf16.xpose.msra.mxu1 %v2339_v41 }
  0x35   :  { %412 = vmatprep.subr.bf16.mxu1 %v2343_v42 }
  0x3b   :  { %373 = vmatpush1.bf16.xpose.msra.mxu0 %v2342_v44 }
  0x3c   :  { %438 = vmatprep.subr.bf16.mxu0 %v2348_v46  ;;  %413 = vmatpush1.bf16.xpose.msra.mxu1 %v2345_v48 }
  0x3d   :  { %1910 = vmatprep.subr.bf16.mxu1 %v2475_v9 }
  0x42   :  { %391 = vmatmul.mubr.bf16.vlgmr.msra.gmra.mxu0 %v111_v52 }
  0x43   :  { %439 = vmatpush1.bf16.xpose.msra.mxu0 %v2346_v53  ;;  %470 = vmatprep.mubr.bf16.mxu0 %v116_v54 }
  0x44   :  { %431 = vmatmul.mubr.bf16.vlgmr.msra.gmra.mxu1 %v113_v55  ;;  %440 = vmatprep.subr.bf16.mxu0 %v2351_v56 }
  0x45   :  { %1911 = vmatpush3.bf16.msra.mxu1 %v2705_v11  ;;  %1926 = vmatprep.mubr.msk.bf16.mxu1 %vm2476_vm0, %v2475_v9 }
  0x46   :  { %1912 = vmatprep.subr.bf16.mxu1 %v2475_v9 }
  0x49   :  { %1913 = vmatpush3.bf16.msra.mxu1 %v2711_v12 }
  0x4a   :  { %1914 = vmatprep.subr.bf16.mxu1 %v2475_v9 }
  0x4b   :  { %441 = vmatpush1.bf16.xpose.msra.mxu0 %v2349_v57 }
  0x4c   :  { %442 = vmatprep.subr.bf16.mxu0 %v2354_v58 }
  0x4d   :  { %1915 = vmatpush3.bf16.msra.mxu1 %v2724_v13 }
  0x4e   :  { %1916 = vmatprep.subr.bf16.mxu1 %v2475_v9 }
  0x51   :  { %1917 = vmatpush3.bf16.msra.mxu1 %v2733_v14 }
  0x52   :  { %1918 = vmatprep.subr.bf16.mxu1 %v2475_v9 }
  0x53   :  { %443 = vmatpush1.bf16.xpose.msra.mxu0 %v2352_v59 }
  0x54   :  { %444 = vmatprep.subr.bf16.mxu0 %v2357_v60 }
  0x55   :  { %1919 = vmatpush3.bf16.msra.mxu1 %v2742_v16 }
  0x56   :  { %1920 = vmatprep.subr.bf16.mxu1 %v2475_v9 }
  0x59   :  { %1921 = vmatpush3.bf16.msra.mxu1 %v2751_v17 }
  0x5a   :  { %1922 = vmatprep.subr.bf16.mxu1 %v2475_v9 }
  0x5b   :  { %445 = vmatpush1.bf16.xpose.msra.mxu0 %v2355_v61 }
  0x5c   :  { %446 = vmatprep.subr.bf16.mxu0 %v2360_v62 }
  0x5d   :  { %1923 = vmatpush3.bf16.msra.mxu1 %v2760_v18 }
  0x5e   :  { %1924 = vmatprep.subr.bf16.mxu1 %v2475_v9 }
  0x61   :  { %1925 = vmatpush3.bf16.msra.mxu1 %v2769_v19 }
  0x62   :  { %1930 = vmatprep.subr.bf16.mxu1 %v2475_v9 }
  0x63   :  { %447 = vmatpush1.bf16.xpose.msra.mxu0 %v2358_v63 }
  0x64   :  { %448 = vmatprep.subr.bf16.mxu0 %v2363_v0 }
  0x6b   :  { %449 = vmatpush1.bf16.xpose.msra.mxu0 %v2361_v1 }
  0x6c   :  { %450 = vmatprep.subr.bf16.mxu0 %v2366_v2 }
  0x73   :  { %451 = vmatpush1.bf16.xpose.msra.mxu0 %v2364_v3 }
  0x74   :  { %452 = vmatprep.subr.bf16.mxu0 %v2369_v4 }
  0x7b   :  { %453 = vmatpush1.bf16.xpose.msra.mxu0 %v2367_v6 }
  0x7c   :  { %1950 = vmatprep.subr.bf16.mxu0 %v2475_v9 }
  0x82   :  { %471 = vmatmul.mubr.bf16.vlgmr.msra.gmra.mxu0 %v115_v8 }
  0x83   :  { %1951 = vmatpush3.bf16.msra.mxu0 %v2705_v11  ;;  %1966 = vmatprep.mubr.msk.bf16.mxu0 %vm2476_vm0, %v2475_v9 }
  0x84   :  { %1952 = vmatprep.subr.bf16.mxu0 %v2475_v9 }
  0x87   :  { %1953 = vmatpush3.bf16.msra.mxu0 %v2711_v12 }
  0x88   :  { %1954 = vmatprep.subr.bf16.mxu0 %v2475_v9 }
  0x8b   :  { %1955 = vmatpush3.bf16.msra.mxu0 %v2724_v13 }
  0x8c   :  { %1956 = vmatprep.subr.bf16.mxu0 %v2475_v9 }
  0x8f   :  { %1957 = vmatpush3.bf16.msra.mxu0 %v2733_v14 }
  0x90   :  { %1958 = vmatprep.subr.bf16.mxu0 %v2475_v9 }
  0x93   :  { %1959 = vmatpush3.bf16.msra.mxu0 %v2742_v16 }
  0x94   :  { %1960 = vmatprep.subr.bf16.mxu0 %v2475_v9 }
  0x97   :  { %1961 = vmatpush3.bf16.msra.mxu0 %v2751_v17 }
  0x98   :  { %1962 = vmatprep.subr.bf16.mxu0 %v2475_v9 }
  0x9b   :  { %1963 = vmatpush3.bf16.msra.mxu0 %v2760_v18 }
  0x9c   :  { %1964 = vmatprep.subr.bf16.mxu0 %v2475_v9 }
  0x9f   :  { %1965 = vmatpush3.bf16.msra.mxu0 %v2769_v19 }
  0xa0   :  { %1990 = vmatprep.subr.bf16.mxu0 %v2475_v9 }
 0x102   :  { %v392_v22 = vpop.f32.mrf.mxu0 }
 0x103   :  { %v393_v32 = vadd.f32 %v392_v22, %v117_v31 }
 0x104   :  { %v394_v23 = vpop.f32.mrf.mxu0  ;;  %v432_v25 = vpop.f32.mrf.mxu1 }
 0x105   :  { %v433_v33 = vadd.f32 %v432_v25, %v393_v32 }
 0x106   :  { %v395_v26 = vpop.f32.mrf.mxu0  ;;  %v434_v27 = vpop.f32.mrf.mxu1 }
 0x108   :  { %v396_v28 = vpop.f32.mrf.mxu0  ;;  %v435_v29 = vpop.f32.mrf.mxu1 }
 0x10a   :  { %v436_v30 = vpop.f32.mrf.mxu1 }
 0x142   :  { %v472_v34 = vpop.f32.mrf.mxu0 }
 0x143   :  { %v473_v35 = vadd.f32 %v472_v34, %v433_v33 }
 0x144   :  { %v474_v36 = vpop.f32.mrf.mxu0 }
 0x145   :  { %2378 = vtanh.f32 %v473_v35 }
 0x146   :  { %v475_v37 = vpop.f32.mrf.mxu0 }
 0x148   :  { %v476_v38 = vpop.f32.mrf.mxu0 }
 0x152   :  { %v2379_v39 = vpop.eup %2378 }
 0x153   :  { %v495_v40 = vmul.f32 %v2379_v39, %v2379_v39 }
 0x155   :  { %v496_v41 = vsub.f32 1.0, %v495_v40 }
 0x157   :  { %v497_v42 = vpack.c.bf16 %v496_v41, %v496_v41 }
 0x159   :  { %1927 = vmatmul.mubr.bf16.vlgmr.msra.gmra.mxu1 %v497_v42 }
 0x15a   :  { %1931 = vmatpush3.bf16.msra.mxu1 %v2705_v11  ;;  %1946 = vmatprep.mubr.msk.bf16.mxu1 %vm2476_vm0, %v2475_v9 }
 0x15b   :  { %1932 = vmatprep.subr.bf16.mxu1 %v2475_v9 }
 0x15e   :  { %1933 = vmatpush3.bf16.msra.mxu1 %v2711_v12 }
 0x15f   :  { %1934 = vmatprep.subr.bf16.mxu1 %v2475_v9 }
 0x162   :  { %1935 = vmatpush3.bf16.msra.mxu1 %v2724_v13 }
 0x163   :  { %1936 = vmatprep.subr.bf16.mxu1 %v2475_v9 }
 0x166   :  { %1937 = vmatpush3.bf16.msra.mxu1 %v2733_v14 }
 0x167   :  { %1938 = vmatprep.subr.bf16.mxu1 %v2475_v9 }
 0x16a   :  { %1939 = vmatpush3.bf16.msra.mxu1 %v2742_v16 }
 0x16b   :  { %1940 = vmatprep.subr.bf16.mxu1 %v2475_v9 }
 0x16e   :  { %1941 = vmatpush3.bf16.msra.mxu1 %v2751_v17 }
 0x16f   :  { %1942 = vmatprep.subr.bf16.mxu1 %v2475_v9 }
 0x172   :  { %1943 = vmatpush3.bf16.msra.mxu1 %v2760_v18 }
 0x173   :  { %1944 = vmatprep.subr.bf16.mxu1 %v2475_v9 }
 0x176   :  { %1945 = vmatpush3.bf16.msra.mxu1 %v2769_v19 }
 0x177   :  { %1970 = vmatprep.subr.bf16.mxu1 %v2475_v9 }
 0x219   :  { %v580_v44 = vpop.f32.mrf.mxu1 }
 0x21a   :  { %v586_v46 = vadd.f32 %v580_v44, %v473_v35 }
 0x21b   :  { %v1928_v48 = vpop.f32.mrf.mxu1 }
 0x21c   :  { %2380 = vtanh.f32 %v586_v46 }
 0x21d   :  { %v583_v49 = vpop.f32.mrf.mxu1 }
 0x21f   :  { %v1929_v50 = vpop.f32.mrf.mxu1 }
 0x229   :  { %v2381_v51 = vpop.eup %2380 }
 0x22a   :  { %v589_v52 = vmul.f32 %v2381_v51, %v2381_v51 }
 0x22c   :  { %v590_v53 = vsub.f32 1.0, %v589_v52 }
 0x22e   :  { %v591_v54 = vpack.c.bf16 %v590_v53, %v590_v53  ;;  %v633_v62 = vadd.f32 %v590_v53, %v496_v41 }
 0x230   :  { %1947 = vmatmul.mubr.bf16.vlgmr.msra.gmra.mxu1 %v591_v54 }
 0x231   :  { %1971 = vmatpush3.bf16.msra.mxu1 %v2705_v11  ;;  %1986 = vmatprep.mubr.msk.bf16.mxu1 %vm2476_vm0, %v2475_v9 }
 0x232   :  { %1972 = vmatprep.subr.bf16.mxu1 %v2475_v9 }
 0x235   :  { %1973 = vmatpush3.bf16.msra.mxu1 %v2711_v12 }
 0x236   :  { %1974 = vmatprep.subr.bf16.mxu1 %v2475_v9 }
 0x239   :  { %1975 = vmatpush3.bf16.msra.mxu1 %v2724_v13 }
 0x23a   :  { %1976 = vmatprep.subr.bf16.mxu1 %v2475_v9 }
 0x23d   :  { %1977 = vmatpush3.bf16.msra.mxu1 %v2733_v14 }
 0x23e   :  { %1978 = vmatprep.subr.bf16.mxu1 %v2475_v9 }
 0x241   :  { %1979 = vmatpush3.bf16.msra.mxu1 %v2742_v16 }
 0x242   :  { %1980 = vmatprep.subr.bf16.mxu1 %v2475_v9 }
 0x245   :  { %1981 = vmatpush3.bf16.msra.mxu1 %v2751_v17 }
 0x246   :  { %1982 = vmatprep.subr.bf16.mxu1 %v2475_v9 }
 0x249   :  { %1983 = vmatpush3.bf16.msra.mxu1 %v2760_v18 }
 0x24a   :  { %1984 = vmatprep.subr.bf16.mxu1 %v2475_v9 }
 0x24d   :  { %1985 = vmatpush3.bf16.msra.mxu1 %v2769_v19 }
 0x24e   :  { %2010 = vmatprep.subr.bf16.mxu1 %v2475_v9 }
 0x2f0   :  { %v626_v55 = vpop.f32.mrf.mxu1 }
 0x2f1   :  { %v632_v56 = vadd.f32 %v626_v55, %v586_v46 }
 0x2f2   :  { %v1948_v57 = vpop.f32.mrf.mxu1 }
 0x2f3   :  { %2382 = vtanh.f32 %v632_v56 }
 0x2f4   :  { %v629_v58 = vpop.f32.mrf.mxu1 }
 0x2f6   :  { %v1949_v59 = vpop.f32.mrf.mxu1 }
 0x300   :  { %v2383_v60 = vpop.eup %2382 }
 0x301   :  { %v635_v61 = vmul.f32 %v2383_v60, %v2383_v60 }
 0x303   :  { %v636_v63 = vsub.f32 1.0, %v635_v61 }
 0x305   :  { %v679_v0 = vadd.f32 %v636_v63, %v633_v62  ;;  %v637_v1 = vpack.c.bf16 %v636_v63, %v636_v63 }
 0x307   :  { %1967 = vmatmul.mubr.bf16.vlgmr.msra.gmra.mxu0 %v637_v1 }
 0x308   :  { %1991 = vmatpush3.bf16.msra.mxu0 %v2705_v11  ;;  %2006 = vmatprep.mubr.msk.bf16.mxu0 %vm2476_vm0, %v2475_v9 }
 0x309   :  { %1992 = vmatprep.subr.bf16.mxu0 %v2475_v9 }
 0x30c   :  { %1993 = vmatpush3.bf16.msra.mxu0 %v2711_v12 }
 0x30d   :  { %1994 = vmatprep.subr.bf16.mxu0 %v2475_v9 }
 0x310   :  { %1995 = vmatpush3.bf16.msra.mxu0 %v2724_v13 }
 0x311   :  { %1996 = vmatprep.subr.bf16.mxu0 %v2475_v9 }
 0x314   :  { %1997 = vmatpush3.bf16.msra.mxu0 %v2733_v14 }
 0x315   :  { %1998 = vmatprep.subr.bf16.mxu0 %v2475_v9 }
 0x318   :  { %1999 = vmatpush3.bf16.msra.mxu0 %v2742_v16 }
 0x319   :  { %2000 = vmatprep.subr.bf16.mxu0 %v2475_v9 }
 0x31c   :  { %2001 = vmatpush3.bf16.msra.mxu0 %v2751_v17 }
 0x31d   :  { %2002 = vmatprep.subr.bf16.mxu0 %v2475_v9 }
 0x320   :  { %2003 = vmatpush3.bf16.msra.mxu0 %v2760_v18 }
 0x321   :  { %2004 = vmatprep.subr.bf16.mxu0 %v2475_v9 }
 0x324   :  { %2005 = vmatpush3.bf16.msra.mxu0 %v2769_v19 }
 0x325   :  { %2030 = vmatprep.subr.bf16.mxu0 %v2475_v9 }
 0x3c7   :  { %v672_v2 = vpop.f32.mrf.mxu0 }
 0x3c8   :  { %v678_v3 = vadd.f32 %v672_v2, %v632_v56 }
 0x3c9   :  { %v1968_v4 = vpop.f32.mrf.mxu0 }
 0x3ca   :  { %2384 = vtanh.f32 %v678_v3 }
 0x3cb   :  { %v675_v6 = vpop.f32.mrf.mxu0 }
 0x3cd   :  { %v1969_v7 = vpop.f32.mrf.mxu0 }
 0x3d7   :  { %v2385_v8 = vpop.eup %2384 }
 0x3d8   :  { %v681_v22 = vmul.f32 %v2385_v8, %v2385_v8 }
 0x3da   :  { %v682_v23 = vsub.f32 1.0, %v681_v22 }
 0x3dc   :  { %v725_v25 = vadd.f32 %v682_v23, %v679_v0  ;;  %v683_v26 = vpack.c.bf16 %v682_v23, %v682_v23 }
 0x3de   :  { %1987 = vmatmul.mubr.bf16.vlgmr.msra.gmra.mxu1 %v683_v26 }
 0x3df   :  { %2011 = vmatpush3.bf16.msra.mxu1 %v2705_v11  ;;  %2026 = vmatprep.mubr.msk.bf16.mxu1 %vm2476_vm0, %v2475_v9 }
 0x3e0   :  { %2012 = vmatprep.subr.bf16.mxu1 %v2475_v9 }
 0x3e3   :  { %2013 = vmatpush3.bf16.msra.mxu1 %v2711_v12 }
 0x3e4   :  { %2014 = vmatprep.subr.bf16.mxu1 %v2475_v9 }
 0x3e7   :  { %2015 = vmatpush3.bf16.msra.mxu1 %v2724_v13 }
 0x3e8   :  { %2016 = vmatprep.subr.bf16.mxu1 %v2475_v9 }
 0x3eb   :  { %2017 = vmatpush3.bf16.msra.mxu1 %v2733_v14 }
 0x3ec   :  { %2018 = vmatprep.subr.bf16.mxu1 %v2475_v9 }
 0x3ef   :  { %2019 = vmatpush3.bf16.msra.mxu1 %v2742_v16 }
 0x3f0   :  { %2020 = vmatprep.subr.bf16.mxu1 %v2475_v9 }
 0x3f3   :  { %2021 = vmatpush3.bf16.msra.mxu1 %v2751_v17 }
 0x3f4   :  { %2022 = vmatprep.subr.bf16.mxu1 %v2475_v9 }
 0x3f7   :  { %2023 = vmatpush3.bf16.msra.mxu1 %v2760_v18 }
 0x3f8   :  { %2024 = vmatprep.subr.bf16.mxu1 %v2475_v9 }
 0x3fb   :  { %2025 = vmatpush3.bf16.msra.mxu1 %v2769_v19 }
 0x3fc   :  { %2050 = vmatprep.subr.bf16.mxu1 %v2475_v9 }
 0x49e   :  { %v718_v27 = vpop.f32.mrf.mxu1 }
 0x49f   :  { %v724_v28 = vadd.f32 %v718_v27, %v678_v3 }
 0x4a0   :  { %v1988_v29 = vpop.f32.mrf.mxu1 }
 0x4a1   :  { %2386 = vtanh.f32 %v724_v28 }
 0x4a2   :  { %v721_v30 = vpop.f32.mrf.mxu1 }
 0x4a4   :  { %v1989_v31 = vpop.f32.mrf.mxu1 }
 0x4ae   :  { %v2387_v32 = vpop.eup %2386 }
 0x4af   :  { %v727_v33 = vmul.f32 %v2387_v32, %v2387_v32 }
 0x4b1   :  { %v728_v34 = vsub.f32 1.0, %v727_v33 }
 0x4b3   :  { %v771_v35 = vadd.f32 %v728_v34, %v725_v25  ;;  %v729_v36 = vpack.c.bf16 %v728_v34, %v728_v34 }
 0x4b5   :  { %2007 = vmatmul.mubr.bf16.vlgmr.msra.gmra.mxu0 %v729_v36 }
 0x4b6   :  { %2031 = vmatpush3.bf16.msra.mxu0 %v2705_v11  ;;  %2046 = vmatprep.mubr.msk.bf16.mxu0 %vm2476_vm0, %v2475_v9 }
 0x4b7   :  { %2032 = vmatprep.subr.bf16.mxu0 %v2475_v9 }
 0x4ba   :  { %2033 = vmatpush3.bf16.msra.mxu0 %v2711_v12 }
 0x4bb   :  { %2034 = vmatprep.subr.bf16.mxu0 %v2475_v9 }
 0x4be   :  { %2035 = vmatpush3.bf16.msra.mxu0 %v2724_v13 }
 0x4bf   :  { %2036 = vmatprep.subr.bf16.mxu0 %v2475_v9 }
 0x4c2   :  { %2037 = vmatpush3.bf16.msra.mxu0 %v2733_v14 }
 0x4c3   :  { %2038 = vmatprep.subr.bf16.mxu0 %v2475_v9 }
 0x4c6   :  { %2039 = vmatpush3.bf16.msra.mxu0 %v2742_v16 }
 0x4c7   :  { %2040 = vmatprep.subr.bf16.mxu0 %v2475_v9 }
 0x4ca   :  { %2041 = vmatpush3.bf16.msra.mxu0 %v2751_v17 }
 0x4cb   :  { %2042 = vmatprep.subr.bf16.mxu0 %v2475_v9 }
 0x4ce   :  { %2043 = vmatpush3.bf16.msra.mxu0 %v2760_v18 }
 0x4cf   :  { %2044 = vmatprep.subr.bf16.mxu0 %v2475_v9 }
 0x4d2   :  { %2045 = vmatpush3.bf16.msra.mxu0 %v2769_v19 }
 0x4d3   :  { %2070 = vmatprep.subr.bf16.mxu0 %v2475_v9 }
 0x575   :  { %v764_v37 = vpop.f32.mrf.mxu0 }
 0x576   :  { %v770_v38 = vadd.f32 %v764_v37, %v724_v28 }
 0x577   :  { %v2008_v39 = vpop.f32.mrf.mxu0 }
 0x578   :  { %2388 = vtanh.f32 %v770_v38 }
 0x579   :  { %v767_v40 = vpop.f32.mrf.mxu0 }
 0x57b   :  { %v2009_v41 = vpop.f32.mrf.mxu0 }
 0x585   :  { %v2389_v42 = vpop.eup %2388 }
 0x586   :  { %v773_v44 = vmul.f32 %v2389_v42, %v2389_v42 }
 0x588   :  { %v774_v46 = vsub.f32 1.0, %v773_v44 }
 0x58a   :  { %v817_v48 = vadd.f32 %v774_v46, %v771_v35  ;;  %v775_v49 = vpack.c.bf16 %v774_v46, %v774_v46 }
 0x58c   :  { %2027 = vmatmul.mubr.bf16.vlgmr.msra.gmra.mxu1 %v775_v49 }
 0x58d   :  { %2051 = vmatpush3.bf16.msra.mxu1 %v2705_v11  ;;  %2066 = vmatprep.mubr.msk.bf16.mxu1 %vm2476_vm0, %v2475_v9 }
 0x58e   :  { %2052 = vmatprep.subr.bf16.mxu1 %v2475_v9 }
 0x591   :  { %2053 = vmatpush3.bf16.msra.mxu1 %v2711_v12 }
 0x592   :  { %2054 = vmatprep.subr.bf16.mxu1 %v2475_v9 }
 0x595   :  { %2055 = vmatpush3.bf16.msra.mxu1 %v2724_v13 }
 0x596   :  { %2056 = vmatprep.subr.bf16.mxu1 %v2475_v9 }
 0x599   :  { %2057 = vmatpush3.bf16.msra.mxu1 %v2733_v14 }
 0x59a   :  { %2058 = vmatprep.subr.bf16.mxu1 %v2475_v9 }
 0x59d   :  { %2059 = vmatpush3.bf16.msra.mxu1 %v2742_v16 }
 0x59e   :  { %2060 = vmatprep.subr.bf16.mxu1 %v2475_v9 }
 0x5a1   :  { %2061 = vmatpush3.bf16.msra.mxu1 %v2751_v17 }
 0x5a2   :  { %2062 = vmatprep.subr.bf16.mxu1 %v2475_v9 }
 0x5a5   :  { %2063 = vmatpush3.bf16.msra.mxu1 %v2760_v18 }
 0x5a6   :  { %2064 = vmatprep.subr.bf16.mxu1 %v2475_v9 }
 0x5a9   :  { %2065 = vmatpush3.bf16.msra.mxu1 %v2769_v19 }
 0x5aa   :  { %2090 = vmatprep.subr.bf16.mxu1 %v2475_v9 }
 0x64c   :  { %v810_v50 = vpop.f32.mrf.mxu1 }
 0x64d   :  { %v816_v51 = vadd.f32 %v810_v50, %v770_v38 }
 0x64e   :  { %v2028_v52 = vpop.f32.mrf.mxu1 }
 0x64f   :  { %2390 = vtanh.f32 %v816_v51 }
 0x650   :  { %v813_v53 = vpop.f32.mrf.mxu1 }
 0x652   :  { %v2029_v54 = vpop.f32.mrf.mxu1 }
 0x65c   :  { %v2391_v55 = vpop.eup %2390 }
 0x65d   :  { %v819_v56 = vmul.f32 %v2391_v55, %v2391_v55 }
 0x65f   :  { %v820_v57 = vsub.f32 1.0, %v819_v56 }
 0x661   :  { %v863_v58 = vadd.f32 %v820_v57, %v817_v48  ;;  %v821_v59 = vpack.c.bf16 %v820_v57, %v820_v57 }
 0x663   :  { %2047 = vmatmul.mubr.bf16.vlgmr.msra.gmra.mxu0 %v821_v59 }
 0x664   :  { %2071 = vmatpush3.bf16.msra.mxu0 %v2705_v11  ;;  %2086 = vmatprep.mubr.msk.bf16.mxu0 %vm2476_vm0, %v2475_v9 }
 0x665   :  { %2072 = vmatprep.subr.bf16.mxu0 %v2475_v9 }
 0x668   :  { %2073 = vmatpush3.bf16.msra.mxu0 %v2711_v12 }
 0x669   :  { %2074 = vmatprep.subr.bf16.mxu0 %v2475_v9 }
 0x66c   :  { %2075 = vmatpush3.bf16.msra.mxu0 %v2724_v13 }
 0x66d   :  { %2076 = vmatprep.subr.bf16.mxu0 %v2475_v9 }
 0x670   :  { %2077 = vmatpush3.bf16.msra.mxu0 %v2733_v14 }
 0x671   :  { %2078 = vmatprep.subr.bf16.mxu0 %v2475_v9 }
 0x674   :  { %2079 = vmatpush3.bf16.msra.mxu0 %v2742_v16 }
 0x675   :  { %2080 = vmatprep.subr.bf16.mxu0 %v2475_v9 }
 0x678   :  { %2081 = vmatpush3.bf16.msra.mxu0 %v2751_v17 }
 0x679   :  { %2082 = vmatprep.subr.bf16.mxu0 %v2475_v9 }
 0x67c   :  { %2083 = vmatpush3.bf16.msra.mxu0 %v2760_v18 }
 0x67d   :  { %2084 = vmatprep.subr.bf16.mxu0 %v2475_v9 }
 0x680   :  { %2085 = vmatpush3.bf16.msra.mxu0 %v2769_v19 }
 0x681   :  { %2110 = vmatprep.subr.bf16.mxu0 %v2475_v9 }
 0x723   :  { %v856_v60 = vpop.f32.mrf.mxu0 }
 0x724   :  { %v862_v61 = vadd.f32 %v856_v60, %v816_v51 }
 0x725   :  { %v2048_v62 = vpop.f32.mrf.mxu0 }
 0x726   :  { %2392 = vtanh.f32 %v862_v61 }
 0x727   :  { %v859_v63 = vpop.f32.mrf.mxu0 }
 0x729   :  { %v2049_v0 = vpop.f32.mrf.mxu0 }
 0x733   :  { %v2393_v1 = vpop.eup %2392 }
 0x734   :  { %v865_v2 = vmul.f32 %v2393_v1, %v2393_v1 }
 0x736   :  { %v866_v3 = vsub.f32 1.0, %v865_v2 }
 0x738   :  { %v909_v4 = vadd.f32 %v866_v3, %v863_v58  ;;  %v867_v6 = vpack.c.bf16 %v866_v3, %v866_v3 }
 0x73a   :  { %2067 = vmatmul.mubr.bf16.vlgmr.msra.gmra.mxu1 %v867_v6 }
 0x73b   :  { %2091 = vmatpush3.bf16.msra.mxu1 %v2705_v11  ;;  %2106 = vmatprep.mubr.msk.bf16.mxu1 %vm2476_vm0, %v2475_v9 }
 0x73c   :  { %2092 = vmatprep.subr.bf16.mxu1 %v2475_v9 }
 0x73f   :  { %2093 = vmatpush3.bf16.msra.mxu1 %v2711_v12 }
 0x740   :  { %2094 = vmatprep.subr.bf16.mxu1 %v2475_v9 }
 0x743   :  { %2095 = vmatpush3.bf16.msra.mxu1 %v2724_v13 }
 0x744   :  { %2096 = vmatprep.subr.bf16.mxu1 %v2475_v9 }
 0x747   :  { %2097 = vmatpush3.bf16.msra.mxu1 %v2733_v14 }
 0x748   :  { %2098 = vmatprep.subr.bf16.mxu1 %v2475_v9 }
 0x74b   :  { %2099 = vmatpush3.bf16.msra.mxu1 %v2742_v16 }
 0x74c   :  { %2100 = vmatprep.subr.bf16.mxu1 %v2475_v9 }
 0x74f   :  { %2101 = vmatpush3.bf16.msra.mxu1 %v2751_v17 }
 0x750   :  { %2102 = vmatprep.subr.bf16.mxu1 %v2475_v9 }
 0x753   :  { %2103 = vmatpush3.bf16.msra.mxu1 %v2760_v18 }
 0x754   :  { %2104 = vmatprep.subr.bf16.mxu1 %v2475_v9 }
 0x757   :  { %2105 = vmatpush3.bf16.msra.mxu1 %v2769_v19 }
 0x758   :  { %2130 = vmatprep.subr.bf16.mxu1 %v2475_v9 }
 0x7fa   :  { %v902_v7 = vpop.f32.mrf.mxu1 }
 0x7fb   :  { %v908_v8 = vadd.f32 %v902_v7, %v862_v61 }
 0x7fc   :  { %v2068_v22 = vpop.f32.mrf.mxu1 }
 0x7fd   :  { %2394 = vtanh.f32 %v908_v8 }
 0x7fe   :  { %v905_v23 = vpop.f32.mrf.mxu1 }
 0x800   :  { %v2069_v25 = vpop.f32.mrf.mxu1 }
 0x80a   :  { %v2395_v26 = vpop.eup %2394 }
 0x80b   :  { %v911_v27 = vmul.f32 %v2395_v26, %v2395_v26 }
 0x80d   :  { %v912_v28 = vsub.f32 1.0, %v911_v27 }
 0x80f   :  { %v955_v29 = vadd.f32 %v912_v28, %v909_v4  ;;  %v913_v30 = vpack.c.bf16 %v912_v28, %v912_v28 }
 0x811   :  { %2087 = vmatmul.mubr.bf16.vlgmr.msra.gmra.mxu0 %v913_v30 }
 0x812   :  { %2111 = vmatpush3.bf16.msra.mxu0 %v2705_v11  ;;  %2126 = vmatprep.mubr.msk.bf16.mxu0 %vm2476_vm0, %v2475_v9 }
 0x813   :  { %2112 = vmatprep.subr.bf16.mxu0 %v2475_v9 }
 0x816   :  { %2113 = vmatpush3.bf16.msra.mxu0 %v2711_v12 }
 0x817   :  { %2114 = vmatprep.subr.bf16.mxu0 %v2475_v9 }
 0x81a   :  { %2115 = vmatpush3.bf16.msra.mxu0 %v2724_v13 }
 0x81b   :  { %2116 = vmatprep.subr.bf16.mxu0 %v2475_v9 }
 0x81e   :  { %2117 = vmatpush3.bf16.msra.mxu0 %v2733_v14 }
 0x81f   :  { %2118 = vmatprep.subr.bf16.mxu0 %v2475_v9 }
 0x822   :  { %2119 = vmatpush3.bf16.msra.mxu0 %v2742_v16 }
 0x823   :  { %2120 = vmatprep.subr.bf16.mxu0 %v2475_v9 }
 0x826   :  { %2121 = vmatpush3.bf16.msra.mxu0 %v2751_v17 }
 0x827   :  { %2122 = vmatprep.subr.bf16.mxu0 %v2475_v9 }
 0x82a   :  { %2123 = vmatpush3.bf16.msra.mxu0 %v2760_v18 }
 0x82b   :  { %2124 = vmatprep.subr.bf16.mxu0 %v2475_v9 }
 0x82e   :  { %2125 = vmatpush3.bf16.msra.mxu0 %v2769_v19 }
 0x82f   :  { %2150 = vmatprep.subr.bf16.mxu0 %v2475_v9 }
 0x8d1   :  { %v948_v31 = vpop.f32.mrf.mxu0 }
 0x8d2   :  { %v954_v32 = vadd.f32 %v948_v31, %v908_v8 }
 0x8d3   :  { %v2088_v33 = vpop.f32.mrf.mxu0 }
 0x8d4   :  { %2396 = vtanh.f32 %v954_v32 }
 0x8d5   :  { %v951_v34 = vpop.f32.mrf.mxu0 }
 0x8d7   :  { %v2089_v35 = vpop.f32.mrf.mxu0 }
 0x8e1   :  { %v2397_v36 = vpop.eup %2396 }
 0x8e2   :  { %v957_v37 = vmul.f32 %v2397_v36, %v2397_v36 }
 0x8e4   :  { %v958_v38 = vsub.f32 1.0, %v957_v37 }
 0x8e6   :  { %v1001_v39 = vadd.f32 %v958_v38, %v955_v29  ;;  %v959_v40 = vpack.c.bf16 %v958_v38, %v958_v38 }
 0x8e8   :  { %2107 = vmatmul.mubr.bf16.vlgmr.msra.gmra.mxu1 %v959_v40 }
 0x8e9   :  { %2131 = vmatpush3.bf16.msra.mxu1 %v2705_v11  ;;  %2146 = vmatprep.mubr.msk.bf16.mxu1 %vm2476_vm0, %v2475_v9 }
 0x8ea   :  { %2132 = vmatprep.subr.bf16.mxu1 %v2475_v9 }
 0x8ed   :  { %2133 = vmatpush3.bf16.msra.mxu1 %v2711_v12 }
 0x8ee   :  { %2134 = vmatprep.subr.bf16.mxu1 %v2475_v9 }
 0x8f1   :  { %2135 = vmatpush3.bf16.msra.mxu1 %v2724_v13 }
 0x8f2   :  { %2136 = vmatprep.subr.bf16.mxu1 %v2475_v9 }
 0x8f5   :  { %2137 = vmatpush3.bf16.msra.mxu1 %v2733_v14 }
 0x8f6   :  { %2138 = vmatprep.subr.bf16.mxu1 %v2475_v9 }
 0x8f9   :  { %2139 = vmatpush3.bf16.msra.mxu1 %v2742_v16 }
 0x8fa   :  { %2140 = vmatprep.subr.bf16.mxu1 %v2475_v9 }
 0x8fd   :  { %2141 = vmatpush3.bf16.msra.mxu1 %v2751_v17 }
 0x8fe   :  { %2142 = vmatprep.subr.bf16.mxu1 %v2475_v9 }
 0x901   :  { %2143 = vmatpush3.bf16.msra.mxu1 %v2760_v18 }
 0x902   :  { %2144 = vmatprep.subr.bf16.mxu1 %v2475_v9 }
 0x905   :  { %2145 = vmatpush3.bf16.msra.mxu1 %v2769_v19 }
 0x906   :  { %2170 = vmatprep.subr.bf16.mxu1 %v2475_v9 }
 0x9a8   :  { %v994_v41 = vpop.f32.mrf.mxu1 }
 0x9a9   :  { %v1000_v42 = vadd.f32 %v994_v41, %v954_v32 }
 0x9aa   :  { %v2108_v44 = vpop.f32.mrf.mxu1 }
 0x9ab   :  { %2398 = vtanh.f32 %v1000_v42 }
 0x9ac   :  { %v997_v46 = vpop.f32.mrf.mxu1 }
 0x9ae   :  { %v2109_v48 = vpop.f32.mrf.mxu1 }
 0x9b8   :  { %v2399_v49 = vpop.eup %2398 }
 0x9b9   :  { %v1003_v50 = vmul.f32 %v2399_v49, %v2399_v49 }
 0x9bb   :  { %v1004_v51 = vsub.f32 1.0, %v1003_v50 }
 0x9bd   :  { %v1047_v52 = vadd.f32 %v1004_v51, %v1001_v39  ;;  %v1005_v53 = vpack.c.bf16 %v1004_v51, %v1004_v51 }
 0x9bf   :  { %2127 = vmatmul.mubr.bf16.vlgmr.msra.gmra.mxu0 %v1005_v53 }
 0x9c0   :  { %2151 = vmatpush3.bf16.msra.mxu0 %v2705_v11  ;;  %2166 = vmatprep.mubr.msk.bf16.mxu0 %vm2476_vm0, %v2475_v9 }
 0x9c1   :  { %2152 = vmatprep.subr.bf16.mxu0 %v2475_v9 }
 0x9c4   :  { %2153 = vmatpush3.bf16.msra.mxu0 %v2711_v12 }
 0x9c5   :  { %2154 = vmatprep.subr.bf16.mxu0 %v2475_v9 }
 0x9c8   :  { %2155 = vmatpush3.bf16.msra.mxu0 %v2724_v13 }
 0x9c9   :  { %2156 = vmatprep.subr.bf16.mxu0 %v2475_v9 }
 0x9cc   :  { %2157 = vmatpush3.bf16.msra.mxu0 %v2733_v14 }
 0x9cd   :  { %2158 = vmatprep.subr.bf16.mxu0 %v2475_v9 }
 0x9d0   :  { %2159 = vmatpush3.bf16.msra.mxu0 %v2742_v16 }
 0x9d1   :  { %2160 = vmatprep.subr.bf16.mxu0 %v2475_v9 }
 0x9d4   :  { %2161 = vmatpush3.bf16.msra.mxu0 %v2751_v17 }
 0x9d5   :  { %2162 = vmatprep.subr.bf16.mxu0 %v2475_v9 }
 0x9d8   :  { %2163 = vmatpush3.bf16.msra.mxu0 %v2760_v18 }
 0x9d9   :  { %2164 = vmatprep.subr.bf16.mxu0 %v2475_v9 }
 0x9dc   :  { %2165 = vmatpush3.bf16.msra.mxu0 %v2769_v19 }
 0x9dd   :  { %2190 = vmatprep.subr.bf16.mxu0 %v2475_v9 }
 0xa7f   :  { %v1040_v54 = vpop.f32.mrf.mxu0 }
 0xa80   :  { %v1046_v55 = vadd.f32 %v1040_v54, %v1000_v42 }
 0xa81   :  { %v2128_v56 = vpop.f32.mrf.mxu0 }
 0xa82   :  { %2400 = vtanh.f32 %v1046_v55  ;;  %v2420_v56 = vld [vmem:[%s3279_s6 + $0x38] sm:$0xff]  }
 0xa83   :  { %v1043_v57 = vpop.f32.mrf.mxu0 }
 0xa84   :  { %v2421_v57 = vld [vmem:[%s3279_s6 + $0x30] sm:$0xff]  }
 0xa85   :  { %v2129_v58 = vpop.f32.mrf.mxu0 }
 0xa8f   :  { %v2401_v59 = vpop.eup %2400 }
 0xa90   :  { %v1049_v60 = vmul.f32 %v2401_v59, %v2401_v59 }
 0xa92   :  { %v1050_v61 = vsub.f32 1.0, %v1049_v60 }
 0xa94   :  { %v1093_v62 = vadd.f32 %v1050_v61, %v1047_v52  ;;  %v1051_v63 = vpack.c.bf16 %v1050_v61, %v1050_v61 }
 0xa96   :  { %2147 = vmatmul.mubr.bf16.vlgmr.msra.gmra.mxu1 %v1051_v63 }
 0xa97   :  { %2171 = vmatpush3.bf16.msra.mxu1 %v2705_v11  ;;  %2186 = vmatprep.mubr.msk.bf16.mxu1 %vm2476_vm0, %v2475_v9 }
 0xa98   :  { %2172 = vmatprep.subr.bf16.mxu1 %v2475_v9 }
 0xa9b   :  { %2173 = vmatpush3.bf16.msra.mxu1 %v2711_v12 }
 0xa9c   :  { %2174 = vmatprep.subr.bf16.mxu1 %v2475_v9 }
 0xa9f   :  { %2175 = vmatpush3.bf16.msra.mxu1 %v2724_v13 }
 0xaa0   :  { %2176 = vmatprep.subr.bf16.mxu1 %v2475_v9 }
 0xaa3   :  { %2177 = vmatpush3.bf16.msra.mxu1 %v2733_v14 }
 0xaa4   :  { %2178 = vmatprep.subr.bf16.mxu1 %v2475_v9 }
 0xaa7   :  { %2179 = vmatpush3.bf16.msra.mxu1 %v2742_v16 }
 0xaa8   :  { %2180 = vmatprep.subr.bf16.mxu1 %v2475_v9 }
 0xaab   :  { %2181 = vmatpush3.bf16.msra.mxu1 %v2751_v17 }
 0xaac   :  { %2182 = vmatprep.subr.bf16.mxu1 %v2475_v9 }
 0xaaf   :  { %2183 = vmatpush3.bf16.msra.mxu1 %v2760_v18 }
 0xab0   :  { %2184 = vmatprep.subr.bf16.mxu1 %v2475_v9 }
 0xab3   :  { %2185 = vmatpush3.bf16.msra.mxu1 %v2769_v19 }
 0xab4   :  { %2210 = vmatprep.subr.bf16.mxu1 %v2475_v9 }
 0xb56   :  { %v1086_v0 = vpop.f32.mrf.mxu1 }
 0xb57   :  { %v1092_v1 = vadd.f32 %v1086_v0, %v1046_v55  ;;  %v2423_v0 = vld [vmem:[%s3279_s6 + $0x28] sm:$0xff]  }
 0xb58   :  { %v2148_v2 = vpop.f32.mrf.mxu1 }
 0xb59   :  { %2402 = vtanh.f32 %v1092_v1  ;;  %v2425_v2 = vld [vmem:[%s3279_s6 + $0x18] sm:$0xff]  }
 0xb5a   :  { %v1089_v3 = vpop.f32.mrf.mxu1 }
 0xb5b   :  { %v2426_v3 = vld [vmem:[%s3279_s6 + $0x10] sm:$0xff]  }
 0xb5c   :  { %v2149_v4 = vpop.f32.mrf.mxu1 }
 0xb5d   :  { %v2427_v4 = vld [vmem:[%s3279_s6 + $0x8] sm:$0xff]  }
 0xb66   :  { %v2403_v6 = vpop.eup %2402 }
 0xb67   :  { %v1095_v7 = vmul.f32 %v2403_v6, %v2403_v6  ;;  %v2428_v6 = vld [vmem:[%s3275_s3 + $0x15c] ss:$24 sps:$4 sm:$0xff]  }
 0xb69   :  { %v1096_v8 = vsub.f32 1.0, %v1095_v7 }
 0xb6b   :  { %v1139_v22 = vadd.f32 %v1096_v8, %v1093_v62  ;;  %v1097_v23 = vpack.c.bf16 %v1096_v8, %v1096_v8 }
 0xb6d   :  { %2167 = vmatmul.mubr.bf16.vlgmr.msra.gmra.mxu0 %v1097_v23 }
 0xb6e   :  { %2191 = vmatpush3.bf16.msra.mxu0 %v2705_v11  ;;  %2206 = vmatprep.mubr.msk.bf16.mxu0 %vm2476_vm0, %v2475_v9 }
 0xb6f   :  { %2192 = vmatprep.subr.bf16.mxu0 %v2475_v9 }
 0xb72   :  { %2193 = vmatpush3.bf16.msra.mxu0 %v2711_v12 }
 0xb73   :  { %2194 = vmatprep.subr.bf16.mxu0 %v2475_v9 }
 0xb76   :  { %2195 = vmatpush3.bf16.msra.mxu0 %v2724_v13 }
 0xb77   :  { %2196 = vmatprep.subr.bf16.mxu0 %v2475_v9 }
 0xb7a   :  { %2197 = vmatpush3.bf16.msra.mxu0 %v2733_v14 }
 0xb7b   :  { %2198 = vmatprep.subr.bf16.mxu0 %v2475_v9 }
 0xb7e   :  { %2199 = vmatpush3.bf16.msra.mxu0 %v2742_v16 }
 0xb7f   :  { %2200 = vmatprep.subr.bf16.mxu0 %v2475_v9 }
 0xb82   :  { %2201 = vmatpush3.bf16.msra.mxu0 %v2751_v17 }
 0xb83   :  { %2202 = vmatprep.subr.bf16.mxu0 %v2475_v9 }
 0xb86   :  { %2203 = vmatpush3.bf16.msra.mxu0 %v2760_v18 }
 0xb87   :  { %2204 = vmatprep.subr.bf16.mxu0 %v2475_v9 }
 0xb8a   :  { %2205 = vmatpush3.bf16.msra.mxu0 %v2769_v19 }
 0xb8b   :  { %2230 = vmatprep.subr.bf16.mxu0 %v2475_v9 }
 0xc2d   :  { %v1132_v25 = vpop.f32.mrf.mxu0 }
 0xc2e   :  { %v1138_v26 = vadd.f32 %v1132_v25, %v1092_v1  ;;  %v2424_v1 = vld [vmem:[%s3279_s6 + $0x20] sm:$0xff]  }
 0xc2f   :  { %v2168_v27 = vpop.f32.mrf.mxu0 }
 0xc30   :  { %2404 = vtanh.f32 %v1138_v26 }
 0xc31   :  { %v1135_v28 = vpop.f32.mrf.mxu0 }
 0xc33   :  { %v2169_v29 = vpop.f32.mrf.mxu0 }
 0xc3d   :  { %v2405_v30 = vpop.eup %2404 }
 0xc3e   :  { %v1141_v31 = vmul.f32 %v2405_v30, %v2405_v30 }
 0xc40   :  { %v1142_v32 = vsub.f32 1.0, %v1141_v31  ;;  %v2431_v31 = vld [vmem:[%s3275_s3 + $0x120] ss:$24 sps:$4 sm:$0xff]  }
 0xc42   :  { %v1185_v33 = vadd.f32 %v1142_v32, %v1139_v22  ;;  %v1143_v34 = vpack.c.bf16 %v1142_v32, %v1142_v32  ;;  %v2432_v32 = vld [vmem:[%s3275_s3 + $0xf4] ss:$24 sps:$4 sm:$0xff]  }
 0xc44   :  { %2187 = vmatmul.mubr.bf16.vlgmr.msra.gmra.mxu1 %v1143_v34  ;;  %v2434_v34 = vld [vmem:[%s3275_s3 + $0xc4] ss:$24 sps:$4 sm:$0xff]  }
 0xc45   :  { %2211 = vmatpush3.bf16.msra.mxu1 %v2705_v11  ;;  %2226 = vmatprep.mubr.msk.bf16.mxu1 %vm2476_vm0, %v2475_v9 }
 0xc46   :  { %2212 = vmatprep.subr.bf16.mxu1 %v2475_v9 }
 0xc49   :  { %2213 = vmatpush3.bf16.msra.mxu1 %v2711_v12 }
 0xc4a   :  { %2214 = vmatprep.subr.bf16.mxu1 %v2475_v9 }
 0xc4d   :  { %2215 = vmatpush3.bf16.msra.mxu1 %v2724_v13 }
 0xc4e   :  { %2216 = vmatprep.subr.bf16.mxu1 %v2475_v9 }
 0xc51   :  { %2217 = vmatpush3.bf16.msra.mxu1 %v2733_v14 }
 0xc52   :  { %2218 = vmatprep.subr.bf16.mxu1 %v2475_v9 }
 0xc55   :  { %2219 = vmatpush3.bf16.msra.mxu1 %v2742_v16 }
 0xc56   :  { %2220 = vmatprep.subr.bf16.mxu1 %v2475_v9 }
 0xc59   :  { %2221 = vmatpush3.bf16.msra.mxu1 %v2751_v17 }
 0xc5a   :  { %2222 = vmatprep.subr.bf16.mxu1 %v2475_v9 }
 0xc5d   :  { %2223 = vmatpush3.bf16.msra.mxu1 %v2760_v18 }
 0xc5e   :  { %2224 = vmatprep.subr.bf16.mxu1 %v2475_v9 }
 0xc61   :  { %2225 = vmatpush3.bf16.msra.mxu1 %v2769_v19 }
 0xc62   :  { %2250 = vmatprep.subr.bf16.mxu1 %v2475_v9 }
 0xd04   :  { %v1178_v35 = vpop.f32.mrf.mxu1 }
 0xd05   :  { %v1184_v36 = vadd.f32 %v1178_v35, %v1138_v26  ;;  %v2435_v35 = vld [vmem:[%s3275_s3 + $0xc0] ss:$24 sps:$4 sm:$0xff]  }
 0xd06   :  { %v2188_v37 = vpop.f32.mrf.mxu1 }
 0xd07   :  { %2406 = vtanh.f32 %v1184_v36  ;;  %v2437_v37 = vld [vmem:[%s3275_s3 + $0x90] ss:$24 sps:$4 sm:$0xff]  }
 0xd08   :  { %v1181_v38 = vpop.f32.mrf.mxu1 }
 0xd09   :  { %v2438_v38 = vld [vmem:[%s3275_s3 + $0x64] ss:$24 sps:$4 sm:$0xff]  }
 0xd0a   :  { %v2189_v39 = vpop.f32.mrf.mxu1 }
 0xd0b   :  { %v2439_v39 = vld [vmem:[%s3275_s3 + $0x60] ss:$24 sps:$4 sm:$0xff]  }
 0xd14   :  { %v2407_v40 = vpop.eup %2406 }
 0xd15   :  { %v1187_v41 = vmul.f32 %v2407_v40, %v2407_v40  ;;  %v2440_v40 = vld [vmem:[%s3275_s3 + $0x34] ss:$24 sps:$4 sm:$0xff]  }
 0xd17   :  { %v1188_v42 = vsub.f32 1.0, %v1187_v41  ;;  %v2441_v41 = vld [vmem:[%s3275_s3 + $0x30] ss:$24 sps:$4 sm:$0xff]  }
 0xd19   :  { %v1231_v44 = vadd.f32 %v1188_v42, %v1185_v33  ;;  %v1189_v46 = vpack.c.bf16 %v1188_v42, %v1188_v42  ;;  %v2433_v33 = vld [vmem:[%s3275_s3 + $0xf0] ss:$24 sps:$4 sm:$0xff]   ;;  %v2442_v42 = vld [vmem:[%s3275_s3 + $0x4] ss:$24 sps:$4 sm:$0xff]  }
 0xd1b   :  { %2207 = vmatmul.mubr.bf16.vlgmr.msra.gmra.mxu0 %v1189_v46  ;;  %v2444_v46 = vld [vmem:[%s3275_s3 + $0x164] ss:$24 sps:$4 sm:$0xff]  }
 0xd1c   :  { %2231 = vmatpush3.bf16.msra.mxu0 %v2705_v11  ;;  %2246 = vmatprep.mubr.msk.bf16.mxu0 %vm2476_vm0, %v2475_v9 }
 0xd1d   :  { %2232 = vmatprep.subr.bf16.mxu0 %v2475_v9 }
 0xd20   :  { %2233 = vmatpush3.bf16.msra.mxu0 %v2711_v12 }
 0xd21   :  { %2234 = vmatprep.subr.bf16.mxu0 %v2475_v9 }
 0xd24   :  { %2235 = vmatpush3.bf16.msra.mxu0 %v2724_v13 }
 0xd25   :  { %2236 = vmatprep.subr.bf16.mxu0 %v2475_v9 }
 0xd28   :  { %2237 = vmatpush3.bf16.msra.mxu0 %v2733_v14 }
 0xd29   :  { %2238 = vmatprep.subr.bf16.mxu0 %v2475_v9 }
 0xd2c   :  { %2239 = vmatpush3.bf16.msra.mxu0 %v2742_v16 }
 0xd2d   :  { %2240 = vmatprep.subr.bf16.mxu0 %v2475_v9 }
 0xd30   :  { %2241 = vmatpush3.bf16.msra.mxu0 %v2751_v17 }
 0xd31   :  { %2242 = vmatprep.subr.bf16.mxu0 %v2475_v9 }
 0xd34   :  { %2243 = vmatpush3.bf16.msra.mxu0 %v2760_v18 }
 0xd35   :  { %2244 = vmatprep.subr.bf16.mxu0 %v2475_v9 }
 0xd38   :  { %2245 = vmatpush3.bf16.msra.mxu0 %v2769_v19 }
 0xd39   :  { %2270 = vmatprep.subr.bf16.mxu0 %v2475_v9 }
 0xddb   :  { %v1224_v11 = vpop.f32.mrf.mxu0 }
 0xddc   :  { %v1230_v12 = vadd.f32 %v1224_v11, %v1184_v36  ;;  %v2436_v36 = vld [vmem:[%s3275_s3 + $0x94] ss:$24 sps:$4 sm:$0xff]  }
 0xddd   :  { %v2208_v48 = vpop.f32.mrf.mxu0 }
 0xdde   :  { %2408 = vtanh.f32 %v1230_v12 }
 0xddf   :  { %v1227_v49 = vpop.f32.mrf.mxu0 }
 0xde1   :  { %v2209_v50 = vpop.f32.mrf.mxu0 }
 0xdeb   :  { %v2409_v51 = vpop.eup %2408 }
 0xdec   :  { %v1233_v52 = vmul.f32 %v2409_v51, %v2409_v51 }
 0xdee   :  { %v1234_v53 = vsub.f32 1.0, %v1233_v52 }
 0xdf0   :  { %v1277_v54 = vadd.f32 %v1234_v53, %v1231_v44  ;;  %v1235_v55 = vpack.c.bf16 %v1234_v53, %v1234_v53  ;;  %v2443_v44 = vld [vmem:[%s3275_s3] ss:$24 sps:$4 sm:$0xff]  }
 0xdf2   :  { %2227 = vmatmul.mubr.bf16.vlgmr.msra.gmra.mxu1 %v1235_v55 }
 0xdf3   :  { %2251 = vmatpush3.bf16.msra.mxu1 %v2420_v56  ;;  %2266 = vmatprep.mubr.msk.bf16.mxu1 %vm2476_vm0, %v2475_v9 }
 0xdf4   :  { %2252 = vmatprep.subr.bf16.mxu1 %v2475_v9 }
 0xdf7   :  { %2253 = vmatpush3.bf16.msra.mxu1 %v2421_v57 }
 0xdf8   :  { %2254 = vmatprep.subr.bf16.mxu1 %v2475_v9 }
 0xdfb   :  { %2255 = vmatpush3.bf16.msra.mxu1 %v2724_v13  ;;  %v2422_v13 = vld [vmem:[%s3275_s3 + $0x154] ss:$24 sps:$4 sm:$0xff]  }
 0xdfc   :  { %2256 = vmatprep.subr.bf16.mxu1 %v2475_v9 }
 0xdff   :  { %2257 = vmatpush3.bf16.msra.mxu1 %v2733_v14 }
 0xe00   :  { %2258 = vmatprep.subr.bf16.mxu1 %v2475_v9 }
 0xe03   :  { %2259 = vmatpush3.bf16.msra.mxu1 %v2742_v16 }
 0xe04   :  { %2260 = vmatprep.subr.bf16.mxu1 %v2475_v9 }
 0xe07   :  { %2261 = vmatpush3.bf16.msra.mxu1 %v2751_v17 }
 0xe08   :  { %2262 = vmatprep.subr.bf16.mxu1 %v2475_v9 }
 0xe0b   :  { %2263 = vmatpush3.bf16.msra.mxu1 %v2760_v18 }
 0xe0c   :  { %2264 = vmatprep.subr.bf16.mxu1 %v2475_v9 }
 0xe0f   :  { %2265 = vmatpush3.bf16.msra.mxu1 %v2769_v19 }
 0xe10   :  { %1423 = vmatprep.subr.bf16.mxu1 %v2422_v13  ;;  %v2447_v13 = vld [vmem:[%s3275_s3 + $0x128] ss:$24 sps:$4 sm:$0xff]  }
 0xeb2   :  { %v1270_v14 = vpop.f32.mrf.mxu1 }
 0xeb3   :  { %v1276_v58 = vadd.f32 %v1270_v14, %v1230_v12  ;;  %v2448_v14 = vld [vmem:[%s3275_s3 + $0xfc] ss:$24 sps:$4 sm:$0xff]  }
 0xeb4   :  { %v2228_v16 = vpop.f32.mrf.mxu1 }
 0xeb5   :  { %2410 = vtanh.f32 %v1276_v58  ;;  %v2450_v16 = vld [vmem:[%s3275_s3 + $0xcc] ss:$24 sps:$4 sm:$0xff]  }
 0xeb6   :  { %v1273_v59 = vpop.f32.mrf.mxu1 }
 0xeb7   :  { %v2451_v59 = vld [vmem:[%s3275_s3 + $0xc8] ss:$24 sps:$4 sm:$0xff]  }
 0xeb8   :  { %v2229_v60 = vpop.f32.mrf.mxu1 }
 0xeb9   :  { %v2452_v60 = vld [vmem:[%s3275_s3 + $0x9c] ss:$24 sps:$4 sm:$0xff]  }
 0xec2   :  { %v2411_v17 = vpop.eup %2410 }
 0xec3   :  { %v1279_v61 = vmul.f32 %v2411_v17, %v2411_v17  ;;  %v2453_v17 = vld [vmem:[%s3275_s3 + $0x98] ss:$24 sps:$4 sm:$0xff]  }
 0xec5   :  { %v1280_v62 = vsub.f32 1.0, %v1279_v61  ;;  %v2454_v61 = vld [vmem:[%s3275_s3 + $0x6c] ss:$24 sps:$4 sm:$0xff]  }
 0xec7   :  { %v1323_v63 = vadd.f32 %v1280_v62, %v1277_v54  ;;  %v1281_v18 = vpack.c.bf16 %v1280_v62, %v1280_v62  ;;  %v2455_v62 = vld [vmem:[%s3275_s3 + $0x68] ss:$24 sps:$4 sm:$0xff]  }
 0xec9   :  { %2247 = vmatmul.mubr.bf16.vlgmr.msra.gmra.mxu0 %v1281_v18  ;;  %v2457_v18 = vld [vmem:[%s3275_s3 + $0x38] ss:$24 sps:$4 sm:$0xff]  }
 0xeca   :  { %2271 = vmatpush3.bf16.msra.mxu0 %v2420_v56  ;;  %2286 = vmatprep.mubr.msk.bf16.mxu0 %vm2476_vm0, %v2475_v9  ;;  %v2445_v56 = vld [vmem:[%s3275_s3 + $0x158] ss:$24 sps:$4 sm:$0xff]  }
 0xecb   :  { %2272 = vmatprep.subr.bf16.mxu0 %v2475_v9 }
 0xece   :  { %2273 = vmatpush3.bf16.msra.mxu0 %v2421_v57  ;;  %v2446_v57 = vld [vmem:[%s3275_s3 + $0x12c] ss:$24 sps:$4 sm:$0xff]  }
 0xecf   :  { %2274 = vmatprep.subr.bf16.mxu0 %v2475_v9 }
 0xed2   :  { %2275 = vmatpush3.bf16.msra.mxu0 %v2423_v0  ;;  %v2458_v0 = vld [vmem:[%s3275_s3 + $0xc] ss:$24 sps:$4 sm:$0xff]  }
 0xed3   :  { %2276 = vmatprep.subr.bf16.mxu0 %v2475_v9 }
 0xed6   :  { %2277 = vmatpush3.bf16.msra.mxu0 %v2424_v1  ;;  %v2459_v1 = vld [vmem:[%s3275_s3 + $0x8] ss:$24 sps:$4 sm:$0xff]  }
 0xed7   :  { %2278 = vmatprep.subr.bf16.mxu0 %v2475_v9 }
 0xeda   :  { %2279 = vmatpush3.bf16.msra.mxu0 %v2425_v2  ;;  %v2477_v2 = vmov 0  }
 0xedb   :  { %2280 = vmatprep.subr.bf16.mxu0 %v2475_v9 }
 0xede   :  { %2281 = vmatpush3.bf16.msra.mxu0 %v2426_v3 }
 0xedf   :  { %2282 = vmatprep.subr.bf16.mxu0 %v2475_v9 }
 0xee2   :  { %2283 = vmatpush3.bf16.msra.mxu0 %v2427_v4 }
 0xee3   :  { %2284 = vmatprep.subr.bf16.mxu0 %v2475_v9  ;;  %v2429_v9 = vld [vmem:[%s3275_s3 + $0x150] ss:$24 sps:$4 sm:$0xff]  }
 0xee6   :  { %2285 = vmatpush3.bf16.msra.mxu0 %v2769_v19  ;;  %v2430_v19 = vld [vmem:[%s3275_s3 + $0x124] ss:$24 sps:$4 sm:$0xff]  }
 0xee7   :  { %1464 = vmatprep.subr.bf16.mxu0 %v2428_v6 }
 0xf89   :  { %v1316_v7 = vpop.f32.mrf.mxu0 }
 0xf8a   :  { %v1322_v8 = vadd.f32 %v1316_v7, %v1276_v58  ;;  %v2449_v58 = vld [vmem:[%s3275_s3 + $0xf8] ss:$24 sps:$4 sm:$0xff]  }
 0xf8b   :  { %v2248_v22 = vpop.f32.mrf.mxu0 }
 0xf8c   :  { %2412 = vtanh.f32 %v1322_v8 }
 0xf8d   :  { %v1319_v23 = vpop.f32.mrf.mxu0 }
 0xf8f   :  { %v2249_v25 = vpop.f32.mrf.mxu0 }
 0xf99   :  { %v2413_v26 = vpop.eup %2412 }
 0xf9a   :  { %v1325_v27 = vmul.f32 %v2413_v26, %v2413_v26  ;;  %v1420_v26 = vld [vmem:[%s3281_s5] sm:$0x1] }
 0xf9c   :  { %v1326_v28 = vsub.f32 1.0, %v1325_v27 }
 0xf9e   :  { %v1369_v29 = vadd.f32 %v1326_v28, %v1323_v63  ;;  %v1327_v30 = vpack.c.bf16 %v1326_v28, %v1326_v28  ;;  %v2456_v63 = vld [vmem:[%s3275_s3 + $0x3c] ss:$24 sps:$4 sm:$0xff]  }
 0xfa0   :  { %2267 = vmatmul.mubr.bf16.vlgmr.msra.gmra.mxu1 %v1327_v30  ;;  %v2460_v30 = vld [vmem:[%s3275_s3 + $0x160] ss:$24 sps:$4 sm:$0xff]  }
 0xfa1   :  { %1424 = vmatpush1.bf16.msra.mxu1 %v2429_v9  ;;  %1455 = vmatprep.mubr.bf16.mxu1 %v2477_v2  ;;  %v2461_v9 = vld [vmem:[%s3275_s3 + $0x134] ss:$24 sps:$4 sm:$0xff]  }
 0xfa2   :  { %1425 = vmatprep.subr.bf16.mxu1 %v2430_v19  ;;  %v2462_v19 = vld [vmem:[%s3275_s3 + $0x130] ss:$24 sps:$4 sm:$0xff]  }
 0xfa5   :  { %1426 = vmatpush1.bf16.msra.mxu1 %v2431_v31  ;;  %v2463_v31 = vld [vmem:[%s3275_s3 + $0x104] ss:$24 sps:$4 sm:$0xff]  }
 0xfa6   :  { %1427 = vmatprep.subr.bf16.mxu1 %v2432_v32  ;;  %v2464_v32 = vld [vmem:[%s3275_s3 + $0x100] ss:$24 sps:$4 sm:$0xff]  }
 0xfa9   :  { %1428 = vmatpush1.bf16.msra.mxu1 %v2433_v33  ;;  %v2465_v33 = vld [vmem:[%s3275_s3 + $0xd4] ss:$24 sps:$4 sm:$0xff]  }
 0xfaa   :  { %1429 = vmatprep.subr.bf16.mxu1 %v2434_v34  ;;  %v2466_v34 = vld [vmem:[%s3275_s3 + $0xd0] ss:$24 sps:$4 sm:$0xff]  }
 0xfad   :  { %1430 = vmatpush1.bf16.msra.mxu1 %v2435_v35  ;;  %v2467_v35 = vld [vmem:[%s3275_s3 + $0xa4] ss:$24 sps:$4 sm:$0xff]  }
 0xfae   :  { %1431 = vmatprep.subr.bf16.mxu1 %v2436_v36  ;;  %v2468_v36 = vld [vmem:[%s3275_s3 + $0xa0] ss:$24 sps:$4 sm:$0xff]  }
 0xfb1   :  { %1432 = vmatpush1.bf16.msra.mxu1 %v2437_v37  ;;  %v2469_v37 = vld [vmem:[%s3275_s3 + $0x74] ss:$24 sps:$4 sm:$0xff]  }
 0xfb2   :  { %1433 = vmatprep.subr.bf16.mxu1 %v2438_v38  ;;  %v2470_v38 = vld [vmem:[%s3275_s3 + $0x70] ss:$24 sps:$4 sm:$0xff]  }
 0xfb5   :  { %1434 = vmatpush1.bf16.msra.mxu1 %v2439_v39  ;;  %v2471_v39 = vld [vmem:[%s3275_s3 + $0x44] ss:$24 sps:$4 sm:$0xff]  }
 0xfb6   :  { %1435 = vmatprep.subr.bf16.mxu1 %v2440_v40  ;;  %v2472_v40 = vld [vmem:[%s3275_s3 + $0x40] ss:$24 sps:$4 sm:$0xff]  }
 0xfb9   :  { %1436 = vmatpush1.bf16.msra.mxu1 %v2441_v41  ;;  %v2473_v41 = vld [vmem:[%s3275_s3 + $0x14] ss:$24 sps:$4 sm:$0xff]  }
 0xfba   :  { %1437 = vmatprep.subr.bf16.mxu1 %v2442_v42  ;;  %v2474_v42 = vld [vmem:[%s3275_s3 + $0x10] ss:$24 sps:$4 sm:$0xff]  }
 0xfbd   :  { %1438 = vmatpush1.bf16.msra.mxu1 %v2443_v44 }
 0xfbe   :  { %1505 = vmatprep.subr.bf16.mxu1 %v2444_v46 }
0x1060   :  { %v1362_v11 = vpop.f32.mrf.mxu1 }
0x1061   :  { %v1368_v12 = vadd.f32 %v1362_v11, %v1322_v8 }
0x1062   :  { %v2268_v48 = vpop.f32.mrf.mxu1 }
0x1063   :  { %2414 = vtanh.f32 %v1368_v12 }
0x1064   :  { %v1365_v49 = vpop.f32.mrf.mxu1 }
0x1066   :  { %v2269_v50 = vpop.f32.mrf.mxu1 }
0x1070   :  { %v2415_v51 = vpop.eup %2414 }
0x1071   :  { %v1371_v52 = vmul.f32 %v2415_v51, %v2415_v51 }
0x1073   :  { %v1372_v53 = vsub.f32 1.0, %v1371_v52  ;;  %v2478_v52 = vmov 1966171168  }
0x1075   :  { %v1415_v54 = vadd.f32 %v1372_v53, %v1369_v29  ;;  %v1373_v55 = vpack.c.bf16 %v1372_v53, %v1372_v53  ;;  %v1556_v53 = vunpack.c.l.s4 %v2478_v52 }
0x1077   :  { %2287 = vmatmul.mubr.bf16.vlgmr.msra.gmra.mxu0 %v1373_v55 }
0x1078   :  { %1465 = vmatpush1.bf16.msra.mxu0 %v2445_v56  ;;  %1496 = vmatprep.mubr.bf16.mxu0 %v2477_v2 }
0x1079   :  { %1466 = vmatprep.subr.bf16.mxu0 %v2446_v57 }
0x107c   :  { %1467 = vmatpush1.bf16.msra.mxu0 %v2447_v13 }
0x107d   :  { %1468 = vmatprep.subr.bf16.mxu0 %v2448_v14 }
0x1080   :  { %1469 = vmatpush1.bf16.msra.mxu0 %v2449_v58 }
0x1081   :  { %1470 = vmatprep.subr.bf16.mxu0 %v2450_v16 }
0x1084   :  { %1471 = vmatpush1.bf16.msra.mxu0 %v2451_v59 }
0x1085   :  { %1472 = vmatprep.subr.bf16.mxu0 %v2452_v60 }
0x1088   :  { %1473 = vmatpush1.bf16.msra.mxu0 %v2453_v17 }
0x1089   :  { %1474 = vmatprep.subr.bf16.mxu0 %v2454_v61 }
0x108c   :  { %1475 = vmatpush1.bf16.msra.mxu0 %v2455_v62 }
0x108d   :  { %1476 = vmatprep.subr.bf16.mxu0 %v2456_v63 }
0x1090   :  { %1477 = vmatpush1.bf16.msra.mxu0 %v2457_v18 }
0x1091   :  { %1478 = vmatprep.subr.bf16.mxu0 %v2458_v0 }
0x1094   :  { %1479 = vmatpush1.bf16.msra.mxu0 %v2459_v1 }
0x1137   :  { %v1408_v3 = vpop.f32.mrf.mxu0 }
0x1138   :  { %v1414_v4 = vadd.f32 %v1408_v3, %v1368_v12 }
0x1139   :  { %v2288_v6 = vpop.f32.mrf.mxu0 }
0x113a   :  { %2416 = vtanh.f32 %v1414_v4 }
0x113b   :  { %v1411_v7 = vpop.f32.mrf.mxu0 }
0x113d   :  { %v2289_v8 = vpop.f32.mrf.mxu0 }
0x1147   :  { %v2417_v22 = vpop.eup %2416 }
0x1148   :  { %v1417_v23 = vmul.f32 %v2417_v22, %v2417_v22 }
0x114a   :  { %v1418_v25 = vsub.f32 1.0, %v1417_v23 }
0x114c   :  { %v1419_v27 = vadd.f32 %v1418_v25, %v1415_v54  ;;  %v1557_v54 = vunpack.c.0.s8 %v1556_v53 }
0x114e   :  { %v1421_v28 = vmul.f32 %v1420_v26, %v1419_v27  ;;  %v1560_v56 = vsub.s32 %v1557_v54, %v2562_v15 }
0x1150   :  { %v1422_v29 = vpack.c.bf16 %v1421_v28, %v1421_v28 }
0x1152   :  { %1456 = vmatmul.mubr.bf16.vlgmr.msra.gmra.mxu1 %v1422_v29  ;;  %1497 = vmatmul.mubr.bf16.vlgmr.msra.gmra.mxu0 %v1422_v29 }
0x1153   :  { %1506 = vmatpush1.bf16.msra.mxu1 %v2460_v30  ;;  %1537 = vmatprep.mubr.bf16.mxu1 %v2477_v2 }
0x1154   :  { %1507 = vmatprep.subr.bf16.mxu1 %v2461_v9 }
0x1157   :  { %1508 = vmatpush1.bf16.msra.mxu1 %v2462_v19 }
0x1158   :  { %1509 = vmatprep.subr.bf16.mxu1 %v2463_v31 }
0x115b   :  { %1510 = vmatpush1.bf16.msra.mxu1 %v2464_v32 }
0x115c   :  { %1511 = vmatprep.subr.bf16.mxu1 %v2465_v33 }
0x115f   :  { %1512 = vmatpush1.bf16.msra.mxu1 %v2466_v34 }
0x1160   :  { %1513 = vmatprep.subr.bf16.mxu1 %v2467_v35 }
0x1163   :  { %1514 = vmatpush1.bf16.msra.mxu1 %v2468_v36 }
0x1164   :  { %1515 = vmatprep.subr.bf16.mxu1 %v2469_v37 }
0x1167   :  { %1516 = vmatpush1.bf16.msra.mxu1 %v2470_v38 }
0x1168   :  { %1517 = vmatprep.subr.bf16.mxu1 %v2471_v39 }
0x116b   :  { %1518 = vmatpush1.bf16.msra.mxu1 %v2472_v40 }
0x116c   :  { %1519 = vmatprep.subr.bf16.mxu1 %v2473_v41 }
0x116f   :  { %1520 = vmatpush1.bf16.msra.mxu1 %v2474_v42 }
0x1172   :  { %1538 = vmatmul.mubr.bf16.vlgmr.msra.gmra.mxu1 %v1422_v29 }
0x1212   :  { %v1457_v44 = vpop.f32.mrf.mxu1  ;;  %v1498_v46 = vpop.f32.mrf.mxu0 }
0x1214   :  { %v1459_v11 = vpop.f32.mrf.mxu1  ;;  %v1500_v12 = vpop.f32.mrf.mxu0 }
0x1215   :  { %v1552_v55 = vcombine.low %v1457_v44, %v1459_v11  ;;  %v1553_v57 = vcombine.low %v1498_v46, %v1500_v12 }
0x1216   :  { %v1461_v48 = vpop.f32.mrf.mxu1  ;;  %v1502_v49 = vpop.f32.mrf.mxu0 }
0x1217   :  { %v1561_v13 = vrot.slane %v1552_v55, %v1560_v56  ;;  %v1568_v14 = vrot.slane %v1553_v57, %v1560_v56 }
0x1218   :  { %v1462_v50 = vpop.f32.mrf.mxu1  ;;  %v1503_v51 = vpop.f32.mrf.mxu0 }
0x1219   :  { %v1576_v59 = vcombine.low %v1561_v13, %v1568_v14 }
0x121b   :  { %v1583_v63 = vrot.slane %v1576_v59, %v1560_v56 }
0x1232   :  { %v1539_v58 = vpop.f32.mrf.mxu1 }
0x1234   :  { %v1541_v16 = vpop.f32.mrf.mxu1 }
0x1235   :  { %v1554_v60 = vcombine.low %v1539_v58, %v1541_v16 }
0x1236   :  { %v1543_v17 = vpop.f32.mrf.mxu1 }
0x1237   :  { %v1575_v61 = vrot.slane %v1554_v60, %v1560_v56 }
0x1238   :  { %v1544_v62 = vpop.f32.mrf.mxu1 }
0x1239   :  { %v1590_v18 = vrot.slane %v1575_v61, %v1560_v56 }
0x123b   :  { %v1591_v0 = vcombine.low %v1583_v63, %v1590_v18 }
0x123d   :  { %v1593_v1 = vadd.f32 %v1591_v0, %v2581_v24 }
0x123f   :  { %v1598_v2 = vrot.slane %v1593_v1, %v83_v43  ;;  %v1602_v3 = vrot.slane %v1593_v1, %v87_v20  ;;  %v1606_v4 = vrot.slane %v1593_v1, %v91_v47  ;;  %v1610_v6 = vrot.slane %v1593_v1, %v95_v21 }
0x1240   :  { %v1614_v7 = vrot.slane %v1593_v1, %v99_v5  ;;  %v1618_v8 = vrot.slane %v1593_v1, %v103_v45 }
0x1241   :  { %v1626_v24 = vsel %vm1625_vm1, %v1598_v2, inf  ;;  %v1627_v22 = vsel %vm1625_vm1, %v1602_v3, inf  ;;  %v1628_v43 = vsel %vm1625_vm1, %v1606_v4, inf  ;;  %v1629_v20 = vsel %vm1625_vm1, %v1610_v6, inf }
0x1242   :  { %v1630_v23 = vsel %vm1625_vm1, %v1614_v7, inf  ;;  %v1632_v47 = vsel %vm1625_vm1, %v1618_v8, inf  ;;  %v1647_v21 = vsel %vm1625_vm1, %v1598_v2, -inf  ;;  %v1648_v5 = vsel %vm1625_vm1, %v1602_v3, -inf }
0x1243   :  { %v1631_v25 = vmin.f32 %v1626_v24, %v1630_v23  ;;  %v1633_v26 = vmin.f32 %v1627_v22, %v1632_v47  ;;  %v1651_v15 = vsel %vm1625_vm1, %v1614_v7, -inf  ;;  %v1653_v45 = vsel %vm1625_vm1, %v1618_v8, -inf }
0x1244   :  { %v1635_v28 = vmin.f32 %v1628_v43, %v1629_v20  ;;  %v1652_v29 = vmax.f32 %v1647_v21, %v1651_v15  ;;  %v1654_v30 = vmax.f32 %v1648_v5, %v1653_v45  ;;  %v1649_v9 = vsel %vm1625_vm1, %v1606_v4, -inf }
0x1245   :  { %v1634_v27 = vmin.f32 %v1631_v25, %v1633_v26  ;;  %v1650_v19 = vsel %vm1625_vm1, %v1610_v6, -inf }
0x1246   :  { %v1655_v32 = vmax.f32 %v1652_v29, %v1654_v30  ;;  %v1656_v33 = vmax.f32 %v1649_v9, %v1650_v19 }
0x1247   :  { %v1636_v31 = vmin.f32 %v1634_v27, %v1635_v28 }
0x1248   :  { %v1657_v34 = vmax.f32 %v1655_v32, %v1656_v33 }
0x1249   :  { %1637 = vmin.xlane.f32.xlu0 %v1636_v31 }
0x124d   :  { %1658 = vmax.xlane.f32.xlu0 %v1657_v34 }
0x12d2   :  { %v1638_v35 = vpop.xlane.xlu0 %1637 }
0x12d3   :  { %v1639_v36 = vrot.slane %v1638_v35, 4 }
0x12d5   :  { %v1640_v37 = vmin.f32 %v1638_v35, %v1639_v36 }
0x12d6   :  { %v1659_v38 = vpop.xlane.xlu0 %1658 }
0x12d7   :  { %v1641_v39 = vrot.slane %v1640_v37, 2  ;;  %v1660_v40 = vrot.slane %v1659_v38, 4 }
0x12d9   :  { %v1661_v41 = vmax.f32 %v1659_v38, %v1660_v40  ;;  %v1642_v42 = vmin.f32 %v1640_v37, %v1641_v39 }
0x12db   :  { %v1662_v44 = vrot.slane %v1661_v41, 2  ;;  %v1643_v46 = vrot.slane %v1642_v42, 1 }
0x12dd   :  { %v1663_v11 = vmax.f32 %v1661_v41, %v1662_v44  ;;  %v1644_v12 = vmin.f32 %v1642_v42, %v1643_v46 }
0x12df   :  { %2290 = vpush %v1644_v12  ;;  %v1664_v48 = vrot.slane %v1663_v11, 1 }
0x12e1   :  { %v1665_v49 = vmax.f32 %v1663_v11, %v1664_v48 }
0x12e3   :  { %2292 = vpush %v1665_v49 }
0x1310   :  { %s2291_s3 = spop %2290 }
0x1311   :  { %v1646_v50 = vstv %s2291_s3 }
0x1312   :  { %v1671_v55 = vsub.f32 %v1593_v1, %v1646_v50 }
0x1314   :  { %s2293_s2 = spop %2292 }
0x1315   :  { %v1667_v51 = vstv %s2293_s2 }
0x1316   :  { %v1668_v52 = vsub.f32 %v1667_v51, %v1646_v50 }
0x1318   :  { %v1669_v53 = vmax.f32 %v1668_v52, 1e-12 }
0x131a   :  { %2418 = vrcp.f32 %v1669_v53 }
0x1327   :  { %v2419_v54 = vpop.eup %2418 }
0x1328   :  { %v1672_v56 = vmul.f32 255.0, %v2419_v54 }
0x132a   :  { %v1673_v57 = vmul.f32 %v1672_v56, %v1671_v55 }
0x132c   :  { %1678 = vst.msk [vmem:[%s3282_s7] sm:$0x3f] %vm1676_vm2, %v1673_v57 }

</bundles_post_ra>
